<compile_context>
chip_gen: v7x
topology: tpu7x:2x2x1
jax: 0.10.0
libtpu: 0.0.40
codegen_flags: <defaults>
</compile_context>

<pallas_src>
import functools

import jax
import jax.numpy as jnp
import numpy as np
from jax.experimental import pallas as pl
from jax.experimental.pallas import tpu as pltpu

PREC = jax.lax.Precision.HIGHEST   # keep f32-accurate matmuls -> tight test tolerance


# ---------------------------------------------------------------------------
# Kernel 1: recurrent GRU, T time steps per grid iteration.
# ---------------------------------------------------------------------------
def gru_kernel(gi_ref, h0_ref, w_hh_ref, b_hh_ref, hs_ref, hn_ref, h_carry,
               *, hidden_dim, steps):
    H = hidden_dim

    # Initialize the carried hidden state from h0 on the first time block.
    @pl.when(pl.program_id(0) == 0)
    def _():
        h_carry[...] = h0_ref[0]

    w_hh = w_hh_ref[...]          # (H, 3H)  packed gate weights, order (r, z, n)
    b_hh = b_hh_ref[...]          # (1, 3H)

    def step(t, h):
        gi = gi_ref[t]            # (B, 3H)  precomputed input projection, step t
        gh = jnp.dot(h, w_hh, precision=PREC,
                     preferred_element_type=jnp.float32) + b_hh        # (B, 3H)
        r = jax.nn.sigmoid(gi[:, 0:H] + gh[:, 0:H])
        z = jax.nn.sigmoid(gi[:, H:2 * H] + gh[:, H:2 * H])
        n = jnp.tanh(gi[:, 2 * H:3 * H] + r * gh[:, 2 * H:3 * H])
        h_new = (1.0 - z) * n + z * h                                   # (B, H)
        hs_ref[t] = h_new
        return h_new

    h_last = jax.lax.fori_loop(0, steps, step, h_carry[...], unroll=True)
    h_carry[...] = h_last         # carry across grid iterations
    hn_ref[0] = h_last            # final hidden (resident output block)


# ---------------------------------------------------------------------------
# Kernel 2: fc_out + log_softmax(dim=1), parallel over (seq tiles, vocab tiles).
# ---------------------------------------------------------------------------
def fc_logsoftmax_kernel(hs_ref, w_ref, b_ref, logp_ref, *, steps):
    w = w_ref[...]                # (H, TV)
    b = b_ref[...]                # (1, TV)

    def body(t, carry):
        logits = jnp.dot(hs_ref[t], w, precision=PREC,
                         preferred_element_type=jnp.float32) + b       # (B, TV)
        # F.log_softmax(output, dim=1) on (S,B,V) -> reduce over the batch axis,
        # which is independent of the vocab tiling.
        m = jnp.max(logits, axis=0, keepdims=True)
        lse = m + jnp.log(jnp.sum(jnp.exp(logits - m), axis=0, keepdims=True))
        logp_ref[t] = logits - lse
        return carry

    jax.lax.fori_loop(0, steps, body, 0, unroll=True)


# ---------------------------------------------------------------------------
# Wrapper
# ---------------------------------------------------------------------------
def decoder_forward(tokens, h0, params, *, time_block=None, s_block=None,
                    v_block=None):
    """tokens: int32 (S, B); h0: f32 (1, B, H).
    Returns (log_probs (S, B, V), h_n (1, B, H))."""
    S, B = tokens.shape
    V, E = params["emb"].shape
    H = params["w_hh"].shape[0]

    T = S if time_block is None else time_block
    TS = S if s_block is None else s_block
    TV = V if v_block is None else v_block
    assert S % T == 0 and S % TS == 0 and V % TV == 0

    # Embedding lookup + dropout (identity, eval mode) -- plain-JAX glue.
    # TODO(synk): train-mode dropout (stateful RNG) not implemented; eval semantics.
    emb = jnp.take(params["emb"], tokens, axis=0).astype(jnp.float32)   # (S, B, E)

    # Input-to-hidden projections for ALL time steps in one big matmul
    # (independent of h -> off the serial critical path).
    gi = (jnp.dot(emb.reshape(S * B, E), params["w_ih"], precision=PREC)
          + params["b_ih"]).reshape(S, B, 3 * H)                        # (S, B, 3H)

    # ---- recurrent GRU kernel ---------------------------------------------
    hs, h_n = pl.pallas_call(
        functools.partial(gru_kernel, hidden_dim=H, steps=T),
        grid_spec=pltpu.PrefetchScalarGridSpec(
            num_scalar_prefetch=0,
            grid=(S // T,),
            in_specs=[
                pl.BlockSpec((T, B, 3 * H), lambda i: (i, 0, 0)),  # gi time block
                pl.BlockSpec((1, B, H),     lambda i: (0, 0, 0)),  # h0 (resident)
                pl.BlockSpec((H, 3 * H),    lambda i: (0, 0)),     # packed W_hh
                pl.BlockSpec((1, 3 * H),    lambda i: (0, 0)),     # packed b_hh
            ],
            out_specs=[
                pl.BlockSpec((T, B, H), lambda i: (i, 0, 0)),      # per-step hidden
                pl.BlockSpec((1, B, H), lambda i: (0, 0, 0)),      # final hidden
            ],
            scratch_shapes=[pltpu.VMEM((B, H), jnp.float32)],      # carried h
        ),
        out_shape=(
            jax.ShapeDtypeStruct((S, B, H), jnp.float32),
            jax.ShapeDtypeStruct((1, B, H), jnp.float32),
        ),
        compiler_params=pltpu.CompilerParams(
            dimension_semantics=("arbitrary",),     # recurrence -> sequential
        ),
    )(gi, h0, params["w_hh"], params["b_hh"])

    # ---- fc_out + log_softmax: parallel, vocab-tiled ------------------------
    logp = pl.pallas_call(
        functools.partial(fc_logsoftmax_kernel, steps=TS),
        grid_spec=pltpu.PrefetchScalarGridSpec(
            num_scalar_prefetch=0,
            grid=(S // TS, V // TV),
            in_specs=[
                pl.BlockSpec((TS, B, H), lambda i, j: (i, 0, 0)),  # hidden states
                pl.BlockSpec((H, TV),    lambda i, j: (0, j)),     # fc_out weight tile
                pl.BlockSpec((1, TV),    lambda i, j: (0, j)),     # fc_out bias tile
            ],
            out_specs=pl.BlockSpec((TS, B, TV), lambda i, j: (i, 0, j)),
        ),
        out_shape=jax.ShapeDtypeStruct((S, B, V), jnp.float32),
        compiler_params=pltpu.CompilerParams(
            dimension_semantics=("parallel", "parallel"),  # megacore-shardable
        ),
    )(hs, params["w_out"], params["b_out"])

    return logp, h_n


def init_params(key, V, E, H):
    """Deterministic parameter init mirroring PyTorch defaults (shapes only).
    GRU gate weights/biases are packed along the last dim in order (r, z, n)."""
    ks = jax.random.split(key, 7)
    k = 1.0 / float(H) ** 0.5
    return {
        "emb":   jax.random.normal(ks[0], (V, E), jnp.float32),             # nn.Embedding
        "w_ih":  jax.random.uniform(ks[1], (E, 3 * H), jnp.float32, -k, k), # packed gates
        "w_hh":  jax.random.uniform(ks[2], (H, 3 * H), jnp.float32, -k, k),
        "b_ih":  jax.random.uniform(ks[3], (1, 3 * H), jnp.float32, -k, k),
        "b_hh":  jax.random.uniform(ks[4], (1, 3 * H), jnp.float32, -k, k),
        "w_out": jax.random.uniform(ks[5], (H, V), jnp.float32, -k, k),     # nn.Linear
        "b_out": jax.random.uniform(ks[6], (1, V), jnp.float32, -k, k),
    }


def reference_forward(tokens, h0, p):
    """Pure-JAX reference for correctness checking (same math as nn.GRU + fc)."""
    S, B = tokens.shape
    H = p["w_hh"].shape[0]
    emb = jnp.take(p["emb"], tokens, axis=0).astype(jnp.float32)            # (S, B, E)
    gi_all = (jnp.dot(emb.reshape(S * B, -1), p["w_ih"], precision=PREC)
              + p["b_ih"]).reshape(S, B, 3 * H)

    def step(h, gi):
        gh = jnp.dot(h, p["w_hh"], precision=PREC) + p["b_hh"]
        r = jax.nn.sigmoid(gi[:, 0:H] + gh[:, 0:H])
        z = jax.nn.sigmoid(gi[:, H:2 * H] + gh[:, H:2 * H])
        n = jnp.tanh(gi[:, 2 * H:] + r * gh[:, 2 * H:])
        h_new = (1.0 - z) * n + z * h
        return h_new, h_new

    h_last, hs = jax.lax.scan(step, h0[0], gi_all)                          # (S, B, H)
    logits = jnp.einsum("sbh,hv->sbv", hs, p["w_out"], precision=PREC) + p["b_out"]
    logp = jax.nn.log_softmax(logits, axis=1)        # dim=1 == batch axis, as in module
    return logp, h_last[None]


if __name__ == "__main__":
    S, B = 8, 4           # seq_len, batch
    V, H, E = 32, 32, 16  # output_dim, hidden_dim, embedding_size

    key = jax.random.PRNGKey(0)
    k_tok, k_h0, k_par = jax.random.split(key, 3)

    tokens = jax.random.randint(k_tok, (S, B), 0, V, dtype=jnp.int32)
    h0 = jax.random.normal(k_h0, (1, B, H), dtype=jnp.float32)
    params = init_params(k_par, V, E, H)

    fwd = jax.jit(lambda t, h, p: decoder_forward(t, h, p,
                                                  time_block=4, s_block=4))
    logp, h_n = fwd(tokens, h0, params)
    jax.block_until_ready((logp, h_n))

    ref_logp, ref_h = reference_forward(tokens, h0, params)
    np.testing.assert_allclose(np.asarray(logp), np.asarray(ref_logp),
                               rtol=1e-4, atol=1e-4)
    np.testing.assert_allclose(np.asarray(h_n), np.asarray(ref_h),
                               rtol=1e-4, atol=1e-4)

    print("KERNEL_OK")
</pallas_src>

<mosaic_0001>
module attributes {stable_mosaic.version = 11 : i64} {
  func.func @fc_logsoftmax_kernel(%arg0: i32, %arg1: i32, %arg2: memref<4x4x32xf32, #tpu.memory_space<vmem>>, %arg3: memref<32x32xf32, #tpu.memory_space<vmem>>, %arg4: memref<1x32xf32, #tpu.memory_space<vmem>>, %arg5: memref<4x4x32xf32, #tpu.memory_space<vmem>>) attributes {dimension_semantics = [#tpu.dimension_semantics<parallel>, #tpu.dimension_semantics<parallel>], iteration_bounds = array<i64: 2, 1>, scalar_prefetch = 0 : i64, scratch_operands = 0 : i64, tpu.core_type = #tpu.core_type<tc>, window_params = [{transform_indices = @transform_0, window_bounds = array<i64: 4, 4, 32>}, {transform_indices = @transform_1, window_bounds = array<i64: 32, 32>}, {transform_indices = @transform_2, window_bounds = array<i64: 1, 32>}, {transform_indices = @transform_3, window_bounds = array<i64: 4, 4, 32>}]} {
    %c0 = arith.constant 0 : index
    %c0_0 = arith.constant 0 : index
    %0 = vector.load %arg3[%c0, %c0_0] : memref<32x32xf32, #tpu.memory_space<vmem>>, vector<32x32xf32>
    %c0_1 = arith.constant 0 : index
    %c0_2 = arith.constant 0 : index
    %1 = vector.load %arg4[%c0_1, %c0_2] : memref<1x32xf32, #tpu.memory_space<vmem>>, vector<1x32xf32>
    %c0_i32 = arith.constant 0 : i32
    %2 = arith.index_cast %c0_i32 : i32 to index
    %c0_3 = arith.constant 0 : index
    %c0_4 = arith.constant 0 : index
    %3 = vector.load %arg2[%2, %c0_3, %c0_4] : memref<4x4x32xf32, #tpu.memory_space<vmem>>, vector<1x4x32xf32>
    %4 = vector.shape_cast %3 : vector<1x4x32xf32> to vector<4x32xf32>
    %cst = arith.constant dense<0.000000e+00> : vector<4x32xf32>
    %5 = tpu.matmul %4, %0, %cst {dimension_numbers = #tpu.dot_dimension_numbers<[1], [0], [0], [1], [0, 0, 1, 1], [], []>, precision = #tpu.contract_precision<fp32>} : vector<4x32xf32>, vector<32x32xf32>, vector<4x32xf32> -> vector<4x32xf32>
    %6 = vector.broadcast %1 : vector<1x32xf32> to vector<4x32xf32>
    %7 = arith.addf %5, %6 : vector<4x32xf32>
    %cst_5 = arith.constant dense<0xFF800000> : vector<32xf32>
    %8 = vector.multi_reduction <maximumf>, %7, %cst_5 [0] : vector<4x32xf32> to vector<32xf32>
    %9 = vector.shape_cast %8 : vector<32xf32> to vector<1x32xf32>
    %10 = vector.broadcast %9 : vector<1x32xf32> to vector<4x32xf32>
    %11 = arith.subf %7, %10 : vector<4x32xf32>
    %12 = math.exp %11 : vector<4x32xf32>
    %cst_6 = arith.constant dense<0.000000e+00> : vector<32xf32>
    %13 = vector.multi_reduction <add>, %12, %cst_6 [0] : vector<4x32xf32> to vector<32xf32>
    %14 = vector.shape_cast %13 : vector<32xf32> to vector<1x32xf32>
    %15 = math.log %14 : vector<1x32xf32>
    %16 = arith.addf %9, %15 : vector<1x32xf32>
    %17 = vector.broadcast %16 : vector<1x32xf32> to vector<4x32xf32>
    %18 = arith.subf %7, %17 : vector<4x32xf32>
    %19 = arith.index_cast %c0_i32 : i32 to index
    %c0_7 = arith.constant 0 : index
    %c0_8 = arith.constant 0 : index
    %20 = vector.load %arg5[%19, %c0_7, %c0_8] : memref<4x4x32xf32, #tpu.memory_space<vmem>>, vector<1x4x32xf32>
    %21 = vector.shape_cast %20 : vector<1x4x32xf32> to vector<4x32xf32>
    %22 = vector.shape_cast %18 : vector<4x32xf32> to vector<1x4x32xf32>
    tpu.vector_store %arg5[%19, %c0_7, %c0_8], %22 {strides = array<i32>} : memref<4x4x32xf32, #tpu.memory_space<vmem>>, vector<1x4x32xf32>,
    %c1_i32 = arith.constant 1 : i32
    %23 = arith.index_cast %c1_i32 : i32 to index
    %c0_9 = arith.constant 0 : index
    %c0_10 = arith.constant 0 : index
    %24 = vector.load %arg2[%23, %c0_9, %c0_10] : memref<4x4x32xf32, #tpu.memory_space<vmem>>, vector<1x4x32xf32>
    %25 = vector.shape_cast %24 : vector<1x4x32xf32> to vector<4x32xf32>
    %cst_11 = arith.constant dense<0.000000e+00> : vector<4x32xf32>
    %26 = tpu.matmul %25, %0, %cst_11 {dimension_numbers = #tpu.dot_dimension_numbers<[1], [0], [0], [1], [0, 0, 1, 1], [], []>, precision = #tpu.contract_precision<fp32>} : vector<4x32xf32>, vector<32x32xf32>, vector<4x32xf32> -> vector<4x32xf32>
    %27 = vector.broadcast %1 : vector<1x32xf32> to vector<4x32xf32>
    %28 = arith.addf %26, %27 : vector<4x32xf32>
    %cst_12 = arith.constant dense<0xFF800000> : vector<32xf32>
    %29 = vector.multi_reduction <maximumf>, %28, %cst_12 [0] : vector<4x32xf32> to vector<32xf32>
    %30 = vector.shape_cast %29 : vector<32xf32> to vector<1x32xf32>
    %31 = vector.broadcast %30 : vector<1x32xf32> to vector<4x32xf32>
    %32 = arith.subf %28, %31 : vector<4x32xf32>
    %33 = math.exp %32 : vector<4x32xf32>
    %cst_13 = arith.constant dense<0.000000e+00> : vector<32xf32>
    %34 = vector.multi_reduction <add>, %33, %cst_13 [0] : vector<4x32xf32> to vector<32xf32>
    %35 = vector.shape_cast %34 : vector<32xf32> to vector<1x32xf32>
    %36 = math.log %35 : vector<1x32xf32>
    %37 = arith.addf %30, %36 : vector<1x32xf32>
    %38 = vector.broadcast %37 : vector<1x32xf32> to vector<4x32xf32>
    %39 = arith.subf %28, %38 : vector<4x32xf32>
    %40 = arith.index_cast %c1_i32 : i32 to index
    %c0_14 = arith.constant 0 : index
    %c0_15 = arith.constant 0 : index
    %41 = vector.load %arg5[%40, %c0_14, %c0_15] : memref<4x4x32xf32, #tpu.memory_space<vmem>>, vector<1x4x32xf32>
    %42 = vector.shape_cast %41 : vector<1x4x32xf32> to vector<4x32xf32>
    %43 = vector.shape_cast %39 : vector<4x32xf32> to vector<1x4x32xf32>
    tpu.vector_store %arg5[%40, %c0_14, %c0_15], %43 {strides = array<i32>} : memref<4x4x32xf32, #tpu.memory_space<vmem>>, vector<1x4x32xf32>,
    %c2_i32 = arith.constant 2 : i32
    %44 = arith.index_cast %c2_i32 : i32 to index
    %c0_16 = arith.constant 0 : index
    %c0_17 = arith.constant 0 : index
    %45 = vector.load %arg2[%44, %c0_16, %c0_17] : memref<4x4x32xf32, #tpu.memory_space<vmem>>, vector<1x4x32xf32>
    %46 = vector.shape_cast %45 : vector<1x4x32xf32> to vector<4x32xf32>
    %cst_18 = arith.constant dense<0.000000e+00> : vector<4x32xf32>
    %47 = tpu.matmul %46, %0, %cst_18 {dimension_numbers = #tpu.dot_dimension_numbers<[1], [0], [0], [1], [0, 0, 1, 1], [], []>, precision = #tpu.contract_precision<fp32>} : vector<4x32xf32>, vector<32x32xf32>, vector<4x32xf32> -> vector<4x32xf32>
    %48 = vector.broadcast %1 : vector<1x32xf32> to vector<4x32xf32>
    %49 = arith.addf %47, %48 : vector<4x32xf32>
    %cst_19 = arith.constant dense<0xFF800000> : vector<32xf32>
    %50 = vector.multi_reduction <maximumf>, %49, %cst_19 [0] : vector<4x32xf32> to vector<32xf32>
    %51 = vector.shape_cast %50 : vector<32xf32> to vector<1x32xf32>
    %52 = vector.broadcast %51 : vector<1x32xf32> to vector<4x32xf32>
    %53 = arith.subf %49, %52 : vector<4x32xf32>
    %54 = math.exp %53 : vector<4x32xf32>
    %cst_20 = arith.constant dense<0.000000e+00> : vector<32xf32>
    %55 = vector.multi_reduction <add>, %54, %cst_20 [0] : vector<4x32xf32> to vector<32xf32>
    %56 = vector.shape_cast %55 : vector<32xf32> to vector<1x32xf32>
    %57 = math.log %56 : vector<1x32xf32>
    %58 = arith.addf %51, %57 : vector<1x32xf32>
    %59 = vector.broadcast %58 : vector<1x32xf32> to vector<4x32xf32>
    %60 = arith.subf %49, %59 : vector<4x32xf32>
    %61 = arith.index_cast %c2_i32 : i32 to index
    %c0_21 = arith.constant 0 : index
    %c0_22 = arith.constant 0 : index
    %62 = vector.load %arg5[%61, %c0_21, %c0_22] : memref<4x4x32xf32, #tpu.memory_space<vmem>>, vector<1x4x32xf32>
    %63 = vector.shape_cast %62 : vector<1x4x32xf32> to vector<4x32xf32>
    %64 = vector.shape_cast %60 : vector<4x32xf32> to vector<1x4x32xf32>
    tpu.vector_store %arg5[%61, %c0_21, %c0_22], %64 {strides = array<i32>} : memref<4x4x32xf32, #tpu.memory_space<vmem>>, vector<1x4x32xf32>,
    %c3_i32 = arith.constant 3 : i32
    %65 = arith.index_cast %c3_i32 : i32 to index
    %c0_23 = arith.constant 0 : index
    %c0_24 = arith.constant 0 : index
    %66 = vector.load %arg2[%65, %c0_23, %c0_24] : memref<4x4x32xf32, #tpu.memory_space<vmem>>, vector<1x4x32xf32>
    %67 = vector.shape_cast %66 : vector<1x4x32xf32> to vector<4x32xf32>
    %cst_25 = arith.constant dense<0.000000e+00> : vector<4x32xf32>
    %68 = tpu.matmul %67, %0, %cst_25 {dimension_numbers = #tpu.dot_dimension_numbers<[1], [0], [0], [1], [0, 0, 1, 1], [], []>, precision = #tpu.contract_precision<fp32>} : vector<4x32xf32>, vector<32x32xf32>, vector<4x32xf32> -> vector<4x32xf32>
    %69 = vector.broadcast %1 : vector<1x32xf32> to vector<4x32xf32>
    %70 = arith.addf %68, %69 : vector<4x32xf32>
    %cst_26 = arith.constant dense<0xFF800000> : vector<32xf32>
    %71 = vector.multi_reduction <maximumf>, %70, %cst_26 [0] : vector<4x32xf32> to vector<32xf32>
    %72 = vector.shape_cast %71 : vector<32xf32> to vector<1x32xf32>
    %73 = vector.broadcast %72 : vector<1x32xf32> to vector<4x32xf32>
    %74 = arith.subf %70, %73 : vector<4x32xf32>
    %75 = math.exp %74 : vector<4x32xf32>
    %cst_27 = arith.constant dense<0.000000e+00> : vector<32xf32>
    %76 = vector.multi_reduction <add>, %75, %cst_27 [0] : vector<4x32xf32> to vector<32xf32>
    %77 = vector.shape_cast %76 : vector<32xf32> to vector<1x32xf32>
    %78 = math.log %77 : vector<1x32xf32>
    %79 = arith.addf %72, %78 : vector<1x32xf32>
    %80 = vector.broadcast %79 : vector<1x32xf32> to vector<4x32xf32>
    %81 = arith.subf %70, %80 : vector<4x32xf32>
    %82 = arith.index_cast %c3_i32 : i32 to index
    %c0_28 = arith.constant 0 : index
    %c0_29 = arith.constant 0 : index
    %83 = vector.load %arg5[%82, %c0_28, %c0_29] : memref<4x4x32xf32, #tpu.memory_space<vmem>>, vector<1x4x32xf32>
    %84 = vector.shape_cast %83 : vector<1x4x32xf32> to vector<4x32xf32>
    %85 = vector.shape_cast %81 : vector<4x32xf32> to vector<1x4x32xf32>
    tpu.vector_store %arg5[%82, %c0_28, %c0_29], %85 {strides = array<i32>} : memref<4x4x32xf32, #tpu.memory_space<vmem>>, vector<1x4x32xf32>,
    %c4_i32 = arith.constant 4 : i32
    return
  }
  func.func @transform_0(%arg0: i32, %arg1: i32) -> (i32, i32, i32) {
    %c0_i32 = arith.constant 0 : i32
    %c0_i32_0 = arith.constant 0 : i32
    %c0_i32_1 = arith.constant 0 : i32
    return %arg0, %c0_i32, %c0_i32_0 : i32, i32, i32
  }
  func.func @transform_1(%arg0: i32, %arg1: i32) -> (i32, i32) {
    %c0_i32 = arith.constant 0 : i32
    %c0_i32_0 = arith.constant 0 : i32
    return %c0_i32, %arg1 : i32, i32
  }
  func.func @transform_2(%arg0: i32, %arg1: i32) -> (i32, i32) {
    %c0_i32 = arith.constant 0 : i32
    %c0_i32_0 = arith.constant 0 : i32
    return %c0_i32, %arg1 : i32, i32
  }
  func.func @transform_3(%arg0: i32, %arg1: i32) -> (i32, i32, i32) {
    %c0_i32 = arith.constant 0 : i32
    %c0_i32_0 = arith.constant 0 : i32
    return %arg0, %c0_i32, %arg1 : i32, i32, i32
  }
}

module attributes {stable_mosaic.version = 11 : i64} {
  func.func @gru_kernel(%arg0: i32, %arg1: memref<4x4x96xf32, #tpu.memory_space<vmem>>, %arg2: memref<1x4x32xf32, #tpu.memory_space<vmem>>, %arg3: memref<32x96xf32, #tpu.memory_space<vmem>>, %arg4: memref<1x96xf32, #tpu.memory_space<vmem>>, %arg5: memref<4x4x32xf32, #tpu.memory_space<vmem>>, %arg6: memref<1x4x32xf32, #tpu.memory_space<vmem>>, %arg7: memref<4x32xf32, #tpu.memory_space<vmem>>) attributes {dimension_semantics = [#tpu.dimension_semantics<arbitrary>], iteration_bounds = array<i64: 2>, scalar_prefetch = 0 : i64, scratch_operands = 1 : i64, tpu.core_type = #tpu.core_type<tc>, window_params = [{transform_indices = @transform_0, window_bounds = array<i64: 4, 4, 96>}, {pipeline_mode = #tpu.pipeline_mode<synchronous>, transform_indices = @transform_1, window_bounds = array<i64: 1, 4, 32>}, {pipeline_mode = #tpu.pipeline_mode<synchronous>, transform_indices = @transform_2, window_bounds = array<i64: 32, 96>}, {pipeline_mode = #tpu.pipeline_mode<synchronous>, transform_indices = @transform_3, window_bounds = array<i64: 1, 96>}, {transform_indices = @transform_4, window_bounds = array<i64: 4, 4, 32>}, {pipeline_mode = #tpu.pipeline_mode<synchronous>, transform_indices = @transform_5, window_bounds = array<i64: 1, 4, 32>}]} {
    %c0_i32 = arith.constant 0 : i32
    %0 = arith.cmpi eq, %arg0, %c0_i32 : i32
    %1 = arith.extui %0 : i1 to i32
    %c0_i32_0 = arith.constant 0 : i32
    %2 = arith.cmpi ne, %1, %c0_i32_0 : i32
    scf.if %2 {
      %c0_43 = arith.constant 0 : index
      %c0_44 = arith.constant 0 : index
      %c0_45 = arith.constant 0 : index
      %154 = vector.load %arg2[%c0_43, %c0_44, %c0_45] : memref<1x4x32xf32, #tpu.memory_space<vmem>>, vector<1x4x32xf32>
      %155 = vector.shape_cast %154 : vector<1x4x32xf32> to vector<4x32xf32>
      %c0_46 = arith.constant 0 : index
      %c0_47 = arith.constant 0 : index
      %156 = vector.load %arg7[%c0_46, %c0_47] : memref<4x32xf32, #tpu.memory_space<vmem>>, vector<4x32xf32>
      tpu.vector_store %arg7[%c0_46, %c0_47], %155 {strides = array<i32>} : memref<4x32xf32, #tpu.memory_space<vmem>>, vector<4x32xf32>,
    } else {
    }
    %c0 = arith.constant 0 : index
    %c0_1 = arith.constant 0 : index
    %3 = vector.load %arg3[%c0, %c0_1] : memref<32x96xf32, #tpu.memory_space<vmem>>, vector<32x96xf32>
    %c0_2 = arith.constant 0 : index
    %c0_3 = arith.constant 0 : index
    %4 = vector.load %arg4[%c0_2, %c0_3] : memref<1x96xf32, #tpu.memory_space<vmem>>, vector<1x96xf32>
    %c0_4 = arith.constant 0 : index
    %c0_5 = arith.constant 0 : index
    %5 = vector.load %arg7[%c0_4, %c0_5] : memref<4x32xf32, #tpu.memory_space<vmem>>, vector<4x32xf32>
    %c0_i32_6 = arith.constant 0 : i32
    %6 = arith.index_cast %c0_i32_6 : i32 to index
    %c0_7 = arith.constant 0 : index
    %c0_8 = arith.constant 0 : index
    %7 = vector.load %arg1[%6, %c0_7, %c0_8] : memref<4x4x96xf32, #tpu.memory_space<vmem>>, vector<1x4x96xf32>
    %8 = vector.shape_cast %7 : vector<1x4x96xf32> to vector<4x96xf32>
    %cst = arith.constant dense<0.000000e+00> : vector<4x96xf32>
    %9 = tpu.matmul %5, %3, %cst {dimension_numbers = #tpu.dot_dimension_numbers<[1], [0], [0], [1], [0, 0, 1, 1], [], []>, precision = #tpu.contract_precision<fp32>} : vector<4x32xf32>, vector<32x96xf32>, vector<4x96xf32> -> vector<4x96xf32>
    %10 = vector.broadcast %4 : vector<1x96xf32> to vector<4x96xf32>
    %11 = arith.addf %9, %10 : vector<4x96xf32>
    %12 = vector.extract_strided_slice %8 {offsets = [0, 0], sizes = [4, 32], strides = [1, 1]} : vector<4x96xf32> to vector<4x32xf32>
    %13 = vector.extract_strided_slice %11 {offsets = [0, 0], sizes = [4, 32], strides = [1, 1]} : vector<4x96xf32> to vector<4x32xf32>
    %14 = arith.addf %12, %13 : vector<4x32xf32>
    %15 = arith.negf %14 : vector<4x32xf32>
    %16 = math.exp %15 : vector<4x32xf32>
    %cst_9 = arith.constant 1.000000e+00 : f32
    %17 = vector.broadcast %cst_9 : f32 to vector<4x32xf32>
    %18 = arith.addf %17, %16 : vector<4x32xf32>
    %19 = arith.divf %17, %18 : vector<4x32xf32>
    %20 = vector.extract_strided_slice %8 {offsets = [0, 32], sizes = [4, 32], strides = [1, 1]} : vector<4x96xf32> to vector<4x32xf32>
    %21 = vector.extract_strided_slice %11 {offsets = [0, 32], sizes = [4, 32], strides = [1, 1]} : vector<4x96xf32> to vector<4x32xf32>
    %22 = arith.addf %20, %21 : vector<4x32xf32>
    %23 = arith.negf %22 : vector<4x32xf32>
    %24 = math.exp %23 : vector<4x32xf32>
    %cst_10 = arith.constant 1.000000e+00 : f32
    %25 = vector.broadcast %cst_10 : f32 to vector<4x32xf32>
    %26 = arith.addf %25, %24 : vector<4x32xf32>
    %27 = arith.divf %25, %26 : vector<4x32xf32>
    %28 = vector.extract_strided_slice %8 {offsets = [0, 64], sizes = [4, 32], strides = [1, 1]} : vector<4x96xf32> to vector<4x32xf32>
    %29 = vector.extract_strided_slice %11 {offsets = [0, 64], sizes = [4, 32], strides = [1, 1]} : vector<4x96xf32> to vector<4x32xf32>
    %30 = arith.mulf %19, %29 : vector<4x32xf32>
    %31 = arith.addf %28, %30 : vector<4x32xf32>
    %32 = math.tanh %31 : vector<4x32xf32>
    %cst_11 = arith.constant 1.000000e+00 : f32
    %33 = vector.broadcast %cst_11 : f32 to vector<4x32xf32>
    %34 = arith.subf %33, %27 : vector<4x32xf32>
    %35 = arith.mulf %34, %32 : vector<4x32xf32>
    %36 = arith.mulf %27, %5 : vector<4x32xf32>
    %37 = arith.addf %35, %36 : vector<4x32xf32>
    %38 = arith.index_cast %c0_i32_6 : i32 to index
    %c0_12 = arith.constant 0 : index
    %c0_13 = arith.constant 0 : index
    %39 = vector.load %arg5[%38, %c0_12, %c0_13] : memref<4x4x32xf32, #tpu.memory_space<vmem>>, vector<1x4x32xf32>
    %40 = vector.shape_cast %39 : vector<1x4x32xf32> to vector<4x32xf32>
    %41 = vector.shape_cast %37 : vector<4x32xf32> to vector<1x4x32xf32>
    tpu.vector_store %arg5[%38, %c0_12, %c0_13], %41 {strides = array<i32>} : memref<4x4x32xf32, #tpu.memory_space<vmem>>, vector<1x4x32xf32>,
    %c1_i32 = arith.constant 1 : i32
    %42 = arith.index_cast %c1_i32 : i32 to index
    %c0_14 = arith.constant 0 : index
    %c0_15 = arith.constant 0 : index
    %43 = vector.load %arg1[%42, %c0_14, %c0_15] : memref<4x4x96xf32, #tpu.memory_space<vmem>>, vector<1x4x96xf32>
    %44 = vector.shape_cast %43 : vector<1x4x96xf32> to vector<4x96xf32>
    %cst_16 = arith.constant dense<0.000000e+00> : vector<4x96xf32>
    %45 = tpu.matmul %37, %3, %cst_16 {dimension_numbers = #tpu.dot_dimension_numbers<[1], [0], [0], [1], [0, 0, 1, 1], [], []>, precision = #tpu.contract_precision<fp32>} : vector<4x32xf32>, vector<32x96xf32>, vector<4x96xf32> -> vector<4x96xf32>
    %46 = vector.broadcast %4 : vector<1x96xf32> to vector<4x96xf32>
    %47 = arith.addf %45, %46 : vector<4x96xf32>
    %48 = vector.extract_strided_slice %44 {offsets = [0, 0], sizes = [4, 32], strides = [1, 1]} : vector<4x96xf32> to vector<4x32xf32>
    %49 = vector.extract_strided_slice %47 {offsets = [0, 0], sizes = [4, 32], strides = [1, 1]} : vector<4x96xf32> to vector<4x32xf32>
    %50 = arith.addf %48, %49 : vector<4x32xf32>
    %51 = arith.negf %50 : vector<4x32xf32>
    %52 = math.exp %51 : vector<4x32xf32>
    %cst_17 = arith.constant 1.000000e+00 : f32
    %53 = vector.broadcast %cst_17 : f32 to vector<4x32xf32>
    %54 = arith.addf %53, %52 : vector<4x32xf32>
    %55 = arith.divf %53, %54 : vector<4x32xf32>
    %56 = vector.extract_strided_slice %44 {offsets = [0, 32], sizes = [4, 32], strides = [1, 1]} : vector<4x96xf32> to vector<4x32xf32>
    %57 = vector.extract_strided_slice %47 {offsets = [0, 32], sizes = [4, 32], strides = [1, 1]} : vector<4x96xf32> to vector<4x32xf32>
    %58 = arith.addf %56, %57 : vector<4x32xf32>
    %59 = arith.negf %58 : vector<4x32xf32>
    %60 = math.exp %59 : vector<4x32xf32>
    %cst_18 = arith.constant 1.000000e+00 : f32
    %61 = vector.broadcast %cst_18 : f32 to vector<4x32xf32>
    %62 = arith.addf %61, %60 : vector<4x32xf32>
    %63 = arith.divf %61, %62 : vector<4x32xf32>
    %64 = vector.extract_strided_slice %44 {offsets = [0, 64], sizes = [4, 32], strides = [1, 1]} : vector<4x96xf32> to vector<4x32xf32>
    %65 = vector.extract_strided_slice %47 {offsets = [0, 64], sizes = [4, 32], strides = [1, 1]} : vector<4x96xf32> to vector<4x32xf32>
    %66 = arith.mulf %55, %65 : vector<4x32xf32>
    %67 = arith.addf %64, %66 : vector<4x32xf32>
    %68 = math.tanh %67 : vector<4x32xf32>
    %cst_19 = arith.constant 1.000000e+00 : f32
    %69 = vector.broadcast %cst_19 : f32 to vector<4x32xf32>
    %70 = arith.subf %69, %63 : vector<4x32xf32>
    %71 = arith.mulf %70, %68 : vector<4x32xf32>
    %72 = arith.mulf %63, %37 : vector<4x32xf32>
    %73 = arith.addf %71, %72 : vector<4x32xf32>
    %74 = arith.index_cast %c1_i32 : i32 to index
    %c0_20 = arith.constant 0 : index
    %c0_21 = arith.constant 0 : index
    %75 = vector.load %arg5[%74, %c0_20, %c0_21] : memref<4x4x32xf32, #tpu.memory_space<vmem>>, vector<1x4x32xf32>
    %76 = vector.shape_cast %75 : vector<1x4x32xf32> to vector<4x32xf32>
    %77 = vector.shape_cast %73 : vector<4x32xf32> to vector<1x4x32xf32>
    tpu.vector_store %arg5[%74, %c0_20, %c0_21], %77 {strides = array<i32>} : memref<4x4x32xf32, #tpu.memory_space<vmem>>, vector<1x4x32xf32>,
    %c2_i32 = arith.constant 2 : i32
    %78 = arith.index_cast %c2_i32 : i32 to index
    %c0_22 = arith.constant 0 : index
    %c0_23 = arith.constant 0 : index
    %79 = vector.load %arg1[%78, %c0_22, %c0_23] : memref<4x4x96xf32, #tpu.memory_space<vmem>>, vector<1x4x96xf32>
    %80 = vector.shape_cast %79 : vector<1x4x96xf32> to vector<4x96xf32>
    %cst_24 = arith.constant dense<0.000000e+00> : vector<4x96xf32>
    %81 = tpu.matmul %73, %3, %cst_24 {dimension_numbers = #tpu.dot_dimension_numbers<[1], [0], [0], [1], [0, 0, 1, 1], [], []>, precision = #tpu.contract_precision<fp32>} : vector<4x32xf32>, vector<32x96xf32>, vector<4x96xf32> -> vector<4x96xf32>
    %82 = vector.broadcast %4 : vector<1x96xf32> to vector<4x96xf32>
    %83 = arith.addf %81, %82 : vector<4x96xf32>
    %84 = vector.extract_strided_slice %80 {offsets = [0, 0], sizes = [4, 32], strides = [1, 1]} : vector<4x96xf32> to vector<4x32xf32>
    %85 = vector.extract_strided_slice %83 {offsets = [0, 0], sizes = [4, 32], strides = [1, 1]} : vector<4x96xf32> to vector<4x32xf32>
    %86 = arith.addf %84, %85 : vector<4x32xf32>
    %87 = arith.negf %86 : vector<4x32xf32>
    %88 = math.exp %87 : vector<4x32xf32>
    %cst_25 = arith.constant 1.000000e+00 : f32
    %89 = vector.broadcast %cst_25 : f32 to vector<4x32xf32>
    %90 = arith.addf %89, %88 : vector<4x32xf32>
    %91 = arith.divf %89, %90 : vector<4x32xf32>
    %92 = vector.extract_strided_slice %80 {offsets = [0, 32], sizes = [4, 32], strides = [1, 1]} : vector<4x96xf32> to vector<4x32xf32>
    %93 = vector.extract_strided_slice %83 {offsets = [0, 32], sizes = [4, 32], strides = [1, 1]} : vector<4x96xf32> to vector<4x32xf32>
    %94 = arith.addf %92, %93 : vector<4x32xf32>
    %95 = arith.negf %94 : vector<4x32xf32>
    %96 = math.exp %95 : vector<4x32xf32>
    %cst_26 = arith.constant 1.000000e+00 : f32
    %97 = vector.broadcast %cst_26 : f32 to vector<4x32xf32>
    %98 = arith.addf %97, %96 : vector<4x32xf32>
    %99 = arith.divf %97, %98 : vector<4x32xf32>
    %100 = vector.extract_strided_slice %80 {offsets = [0, 64], sizes = [4, 32], strides = [1, 1]} : vector<4x96xf32> to vector<4x32xf32>
    %101 = vector.extract_strided_slice %83 {offsets = [0, 64], sizes = [4, 32], strides = [1, 1]} : vector<4x96xf32> to vector<4x32xf32>
    %102 = arith.mulf %91, %101 : vector<4x32xf32>
    %103 = arith.addf %100, %102 : vector<4x32xf32>
    %104 = math.tanh %103 : vector<4x32xf32>
    %cst_27 = arith.constant 1.000000e+00 : f32
    %105 = vector.broadcast %cst_27 : f32 to vector<4x32xf32>
    %106 = arith.subf %105, %99 : vector<4x32xf32>
    %107 = arith.mulf %106, %104 : vector<4x32xf32>
    %108 = arith.mulf %99, %73 : vector<4x32xf32>
    %109 = arith.addf %107, %108 : vector<4x32xf32>
    %110 = arith.index_cast %c2_i32 : i32 to index
    %c0_28 = arith.constant 0 : index
    %c0_29 = arith.constant 0 : index
    %111 = vector.load %arg5[%110, %c0_28, %c0_29] : memref<4x4x32xf32, #tpu.memory_space<vmem>>, vector<1x4x32xf32>
    %112 = vector.shape_cast %111 : vector<1x4x32xf32> to vector<4x32xf32>
    %113 = vector.shape_cast %109 : vector<4x32xf32> to vector<1x4x32xf32>
    tpu.vector_store %arg5[%110, %c0_28, %c0_29], %113 {strides = array<i32>} : memref<4x4x32xf32, #tpu.memory_space<vmem>>, vector<1x4x32xf32>,
    %c3_i32 = arith.constant 3 : i32
    %114 = arith.index_cast %c3_i32 : i32 to index
    %c0_30 = arith.constant 0 : index
    %c0_31 = arith.constant 0 : index
    %115 = vector.load %arg1[%114, %c0_30, %c0_31] : memref<4x4x96xf32, #tpu.memory_space<vmem>>, vector<1x4x96xf32>
    %116 = vector.shape_cast %115 : vector<1x4x96xf32> to vector<4x96xf32>
    %cst_32 = arith.constant dense<0.000000e+00> : vector<4x96xf32>
    %117 = tpu.matmul %109, %3, %cst_32 {dimension_numbers = #tpu.dot_dimension_numbers<[1], [0], [0], [1], [0, 0, 1, 1], [], []>, precision = #tpu.contract_precision<fp32>} : vector<4x32xf32>, vector<32x96xf32>, vector<4x96xf32> -> vector<4x96xf32>
    %118 = vector.broadcast %4 : vector<1x96xf32> to vector<4x96xf32>
    %119 = arith.addf %117, %118 : vector<4x96xf32>
    %120 = vector.extract_strided_slice %116 {offsets = [0, 0], sizes = [4, 32], strides = [1, 1]} : vector<4x96xf32> to vector<4x32xf32>
    %121 = vector.extract_strided_slice %119 {offsets = [0, 0], sizes = [4, 32], strides = [1, 1]} : vector<4x96xf32> to vector<4x32xf32>
    %122 = arith.addf %120, %121 : vector<4x32xf32>
    %123 = arith.negf %122 : vector<4x32xf32>
    %124 = math.exp %123 : vector<4x32xf32>
    %cst_33 = arith.constant 1.000000e+00 : f32
    %125 = vector.broadcast %cst_33 : f32 to vector<4x32xf32>
    %126 = arith.addf %125, %124 : vector<4x32xf32>
    %127 = arith.divf %125, %126 : vector<4x32xf32>
    %128 = vector.extract_strided_slice %116 {offsets = [0, 32], sizes = [4, 32], strides = [1, 1]} : vector<4x96xf32> to vector<4x32xf32>
    %129 = vector.extract_strided_slice %119 {offsets = [0, 32], sizes = [4, 32], strides = [1, 1]} : vector<4x96xf32> to vector<4x32xf32>
    %130 = arith.addf %128, %129 : vector<4x32xf32>
    %131 = arith.negf %130 : vector<4x32xf32>
    %132 = math.exp %131 : vector<4x32xf32>
    %cst_34 = arith.constant 1.000000e+00 : f32
    %133 = vector.broadcast %cst_34 : f32 to vector<4x32xf32>
    %134 = arith.addf %133, %132 : vector<4x32xf32>
    %135 = arith.divf %133, %134 : vector<4x32xf32>
    %136 = vector.extract_strided_slice %116 {offsets = [0, 64], sizes = [4, 32], strides = [1, 1]} : vector<4x96xf32> to vector<4x32xf32>
    %137 = vector.extract_strided_slice %119 {offsets = [0, 64], sizes = [4, 32], strides = [1, 1]} : vector<4x96xf32> to vector<4x32xf32>
    %138 = arith.mulf %127, %137 : vector<4x32xf32>
    %139 = arith.addf %136, %138 : vector<4x32xf32>
    %140 = math.tanh %139 : vector<4x32xf32>
    %cst_35 = arith.constant 1.000000e+00 : f32
    %141 = vector.broadcast %cst_35 : f32 to vector<4x32xf32>
    %142 = arith.subf %141, %135 : vector<4x32xf32>
    %143 = arith.mulf %142, %140 : vector<4x32xf32>
    %144 = arith.mulf %135, %109 : vector<4x32xf32>
    %145 = arith.addf %143, %144 : vector<4x32xf32>
    %146 = arith.index_cast %c3_i32 : i32 to index
    %c0_36 = arith.constant 0 : index
    %c0_37 = arith.constant 0 : index
    %147 = vector.load %arg5[%146, %c0_36, %c0_37] : memref<4x4x32xf32, #tpu.memory_space<vmem>>, vector<1x4x32xf32>
    %148 = vector.shape_cast %147 : vector<1x4x32xf32> to vector<4x32xf32>
    %149 = vector.shape_cast %145 : vector<4x32xf32> to vector<1x4x32xf32>
    tpu.vector_store %arg5[%146, %c0_36, %c0_37], %149 {strides = array<i32>} : memref<4x4x32xf32, #tpu.memory_space<vmem>>, vector<1x4x32xf32>,
    %c4_i32 = arith.constant 4 : i32
    %c0_38 = arith.constant 0 : index
    %c0_39 = arith.constant 0 : index
    %150 = vector.load %arg7[%c0_38, %c0_39] : memref<4x32xf32, #tpu.memory_space<vmem>>, vector<4x32xf32>
    tpu.vector_store %arg7[%c0_38, %c0_39], %145 {strides = array<i32>} : memref<4x32xf32, #tpu.memory_space<vmem>>, vector<4x32xf32>,
    %c0_40 = arith.constant 0 : index
    %c0_41 = arith.constant 0 : index
    %c0_42 = arith.constant 0 : index
    %151 = vector.load %arg6[%c0_40, %c0_41, %c0_42] : memref<1x4x32xf32, #tpu.memory_space<vmem>>, vector<1x4x32xf32>
    %152 = vector.shape_cast %151 : vector<1x4x32xf32> to vector<4x32xf32>
    %153 = vector.shape_cast %145 : vector<4x32xf32> to vector<1x4x32xf32>
    tpu.vector_store %arg6[%c0_40, %c0_41, %c0_42], %153 {strides = array<i32>} : memref<1x4x32xf32, #tpu.memory_space<vmem>>, vector<1x4x32xf32>,
    return
  }
  func.func @transform_0(%arg0: i32) -> (i32, i32, i32) {
    %c0_i32 = arith.constant 0 : i32
    %c0_i32_0 = arith.constant 0 : i32
    %c0_i32_1 = arith.constant 0 : i32
    return %arg0, %c0_i32, %c0_i32_0 : i32, i32, i32
  }
  func.func @transform_1(%arg0: i32) -> (i32, i32, i32) {
    %c0_i32 = arith.constant 0 : i32
    %c0_i32_0 = arith.constant 0 : i32
    %c0_i32_1 = arith.constant 0 : i32
    %c0_i32_2 = arith.constant 0 : i32
    return %c0_i32, %c0_i32_0, %c0_i32_1 : i32, i32, i32
  }
  func.func @transform_2(%arg0: i32) -> (i32, i32) {
    %c0_i32 = arith.constant 0 : i32
    %c0_i32_0 = arith.constant 0 : i32
    %c0_i32_1 = arith.constant 0 : i32
    return %c0_i32, %c0_i32_0 : i32, i32
  }
  func.func @transform_3(%arg0: i32) -> (i32, i32) {
    %c0_i32 = arith.constant 0 : i32
    %c0_i32_0 = arith.constant 0 : i32
    %c0_i32_1 = arith.constant 0 : i32
    return %c0_i32, %c0_i32_0 : i32, i32
  }
  func.func @transform_4(%arg0: i32) -> (i32, i32, i32) {
    %c0_i32 = arith.constant 0 : i32
    %c0_i32_0 = arith.constant 0 : i32
    %c0_i32_1 = arith.constant 0 : i32
    return %arg0, %c0_i32, %c0_i32_0 : i32, i32, i32
  }
  func.func @transform_5(%arg0: i32) -> (i32, i32, i32) {
    %c0_i32 = arith.constant 0 : i32
    %c0_i32_0 = arith.constant 0 : i32
    %c0_i32_1 = arith.constant 0 : i32
    %c0_i32_2 = arith.constant 0 : i32
    return %c0_i32, %c0_i32_0, %c0_i32_1 : i32, i32, i32
  }
}

</mosaic_0001>

<bundles_post_ra>
// kernel: _lambda_.3
= control target key start
LH: loop header
LB: loop body
LE: loop exit
PB: predicated region body
PF: predicated region fallthrough
CT: control target
= control target key end

     0   :  { %8 = vsyncpa [#allocation3], 0  ;;  %s3583_s0 = inlined_call_operand.vmem [shape: f32[8,4,32], index: 0, kind: input, shape index: {}]   ;;  %s3584_s1 = inlined_call_operand.vmem [shape: f32[32,32], index: 1, kind: input, shape index: {}]   ;;  %s3585_s2 = inlined_call_operand.vmem [shape: f32[1,32], index: 2, kind: input, shape index: {}]   ;;  %s3586_s3 = inlined_call_operand.hbm [shape: f32[8,4,32], index: 3, kind: output, shape index: {}]  }
   0x1   :  { %10 = vsyncpa [#allocation3 + $0x1], 0  ;;  %s3171_s12 = smov 0   ;;  %s3173_s13 = smov 0  }
   0x2   :  { %s3175_s14 = smov 0   ;;  %s3177_s15 = smov 0  }
   0x3   :  { %s3179_s16 = smov 0   ;;  %s3181_s17 = smov 0  }
   0x4 LB: > { %s2394_s18 = sadd.s32 4294967295, %s3143_s17   ;;  %s2395_s19 = sadd.s32 4294967294, %s3143_s17   ;;  %s3143_s17 = sphi %s3181_s17, %s16_s17   ;;  %s3139_s16 = sphi %s3179_s16, %s3593_s16   ;;  %s3135_s15 = sphi %s3177_s15, %s3592_s15   ;;  %s3131_s14 = sphi %s3175_s14, %s3591_s14   ;;  %s3127_s13 = sphi %s3173_s13, %s3590_s13   ;;  %s3123_s12 = sphi %s3171_s12, %s3589_s12  }
   0x5   : > { %s28_s20 = sadd.s32 1, %s3139_s16  ;;  %s115_s21 = sadd.s32 1, %s3131_s14 }
   0x6   : > { %p30_p0 = scmp.ge.s32.totalorder %s28_s20, 2  ;;  %p125_p1 = scmp.ne.s32.totalorder %s3131_s14, %s3127_s13 }
   0x7   : > { %p126_p2 = scmp.eq.s32.totalorder %s2394_s18, 1  ;;  %p131_p3 = scmp.ne.s32.totalorder %s3127_s13, %s3123_s12 }
   0x8   : > { %s3595_s20 = smov (%p30_p0, %s28_s20), 0  ;;  %p132_p5 = scmp.eq.s32.totalorder %s2395_s19, 1 }
   0x9   : > { %p3211_p4 = por %p126_p2, %p125_p1  ;;  %s110_s23 = ssub.s32 %s3139_s16, %s3595_s20 }
   0xa   : > { %p2400_p6 = scmp.ge.s32.totalorder %s3143_s17, 1  ;;  %p113_p7 = scmp.eq.s32.totalorder %s110_s23, 0 }
   0xb   : > { %p3218_p8 = por %p132_p5, %p131_p3  ;;  %p172_p9 = scmp.lt.s32.totalorder %s3143_s17, 3 }
   0xc   : > { %s3224_s25 = scalar_select %p113_p7, %s3131_s14, %s115_s21  }
   0xd   : > { %p173_p10 = pnand %p2400_p6, %p172_p9 }
   0xe   : > { %v217_v0 = vld [vmem:[%s3584_s1] sm:$0xff] (!%p173_p10)  ;;  %v218_v1 = vld [vmem:[%s3584_s1 + $0x8] sm:$0xff] (!%p173_p10)  ;;  %v219_v2 = vld [vmem:[%s3584_s1 + $0x10] sm:$0xff] (!%p173_p10)  ;;  %v3145_v3 = vmov (!%p173_p10), 0.0|0.0   ;;  %s2402_s7 = sshll.u32 (!%p173_p10), %s3135_s15, 2  ;;  %vm3146_vm0 = vmmov (!%p173_p10), 0  }
   0xf   : > { %176 = sbr.rel (%p173_p10) target bundleno = 413 (0x19d), region = 32  ;;  %2801 = vmatprep.subr.bf16.mxu0 (!%p173_p10), %v3145_v3  ;;  %2837 = vmatprep.subr.bf16.mxu1 (!%p173_p10), %v3145_v3  ;;  %v234_v4 = vand.u32 (!%p173_p10), 4294901760, %v217_v0  ;;  %v237_v5 = vand.u32 (!%p173_p10), 4294901760, %v218_v1  ;;  %v220_v6 = vld [vmem:[%s3584_s1 + $0x18] sm:$0xff] (!%p173_p10)  ;;  %v240_v7 = vand.u32 (!%p173_p10), 4294901760, %v219_v2  ;;  %v3147_v9 = vmov (!%p173_p10), 0.0  }
  0x10   : > { %v243_v8 = vand.u32 (!%p173_p10), 4294901760, %v220_v6  ;;  %2545 = vmatprep.mubr.msk.f32.mxu0 (!%p173_p10), %vm3146_vm0, %v3147_v9  ;;  %2611 = vmatprep.mubr.msk.f32.mxu1 (!%p173_p10), %vm3146_vm0, %v3147_v9  ;;  %p204_p11 = scmp.lt.s32.totalorder (!%p173_p10), %s2402_s7, 7  ;;  %vm229_vm1 = vcmask (!%p173_p10), 261120   ;;  %v2404_v62 = vld [vmem:[%s3585_s2] ss:$0 sm:$0xff] (!%p173_p10)  ;;  %vm718_vm2 = vcmask (!%p173_p10), 257024  }
  0x11   : > { %v3245_v10 = vpack.c.bf16 (!%p173_p10), %v237_v5, %v234_v4  ;;  %v3247_v11 = vsub.f32 (!%p173_p10), %v217_v0, %v234_v4  ;;  %v3249_v12 = vsub.f32 (!%p173_p10), %v218_v1, %v237_v5  ;;  %v3251_v13 = vsub.f32 (!%p173_p10), %v219_v2, %v240_v7  ;;  %s200_s21 = sand.u32 (!%p173_p10), 1, %s3127_s13   ;;  %s2416_s27 = sshll.u32 (!%p173_p10), %s3135_s15, 8 }
  0x12   : > { %v3253_v14 = vsub.f32 (!%p173_p10), %v220_v6, %v243_v8  ;;  %v3257_v15 = vpack.c.bf16 (!%p173_p10), %v243_v8, %v240_v7  ;;  %s2401_s23 = sshll.u32 (!%p173_p10), %s200_s21, 4  ;;  %s3526_s4 = scalar_lea.hbm (!%p173_p10), %s3586_s3, %s2416_s27 }
  0x13   : > { %2803 = vmatpush3.bf16.msra.mxu0 (!%p173_p10), %v3245_v10  ;;  %2839 = vmatpush3.bf16.msra.mxu1 (!%p173_p10), %v3245_v10  ;;  %v315_v16 = vand.u32 (!%p173_p10), 4294901760, %v3247_v11  ;;  %v322_v17 = vand.u32 (!%p173_p10), 4294901760, %v3249_v12  ;;  %v329_v20 = vand.u32 (!%p173_p10), 4294901760, %v3251_v13  ;;  %v3312_v44 = vpack.c.bf16 (!%p173_p10), %v3249_v12, %v3247_v11  ;;  %s3510_s26 = scalar_lea.vmem (!%p173_p10), [#allocation2], %s2401_s23  ;;  %s3537_s15 = scalar_lea.sflag (!%p173_p10), [#allocation3], %s200_s21 }
  0x14   : > { %2804 = vmatprep.subr.bf16.mxu0 (!%p173_p10), %v3145_v3  ;;  %2840 = vmatprep.subr.bf16.mxu1 (!%p173_p10), %v3145_v3  ;;  %v336_v21 = vand.u32 (!%p173_p10), 4294901760, %v3253_v14  ;;  %v3322_v45 = vpack.c.bf16 (!%p173_p10), %v3253_v14, %v3251_v13  ;;  %s2295_s28 = sshll.u32 (!%p173_p10), %s3510_s26, 4  ;;  %s3148_s6 = smov (!%p173_p10), [#allocation2]   ;;  %s3528_s28 = int_to_ptr.vmem [resolvable:$true] %s2295_s28 }
  0x15   : > { %v316_v23 = vsub.f32 (!%p173_p10), %v3247_v11, %v315_v16  ;;  %v323_v24 = vsub.f32 (!%p173_p10), %v3249_v12, %v322_v17  ;;  %v330_v32 = vsub.f32 (!%p173_p10), %v3251_v13, %v329_v20  ;;  %v3348_v46 = vpack.c.bf16 (!%p173_p10), %v322_v17, %v315_v16  ;;  %s3065_s5 = scalar_lea.vmem (!%p173_p10), %s3528_s28, 256 }
  0x16   : > { %s3597_s7 = smov (!%p204_p11, %s2402_s7), 7  ;;  %v337_v33 = vsub.f32 %v3253_v14, %v336_v21  ;;  %v3360_v49 = vpack.c.bf16 %v336_v21, %v329_v20  ;;  %p3066_p12 = scmp.ne.s32.totalorder %s3528_s28, %s3065_s5 }
  0x17   : > { %s2403_s8 = sshll.u32 %s3597_s7, 2  ;;  %2806 = vmatpush3.bf16.msra.mxu0 %v3257_v15  ;;  %2842 = vmatpush3.bf16.msra.mxu1 %v3257_v15  ;;  %v317_v30 = vand.u32 4294901760, %v316_v23  ;;  %v324_v31 = vand.u32 4294901760, %v323_v24  ;;  %v331_v39 = vand.u32 4294901760, %v330_v32  ;;  %s3069_s7 = sshll.u32 %s3148_s6, 4  ;;  %s3070_s7 = int_to_ptr.vmem [resolvable:$false] %s3069_s7 }
  0x18   : > { %s3266_s11 = scalar_lea.vmem %s3583_s0, %s2403_s8  ;;  %2807 = vmatprep.subr.bf16.mxu0 %v3145_v3  ;;  %2843 = vmatprep.subr.bf16.mxu1 %v3145_v3  ;;  %v338_v40 = vand.u32 4294901760, %v337_v33  ;;  %p3067_p13 = pnand %p3066_p12, %p3211_p4 }
  0x19   : > { %v222_v18 = vld [vmem:[%s3266_s11] sm:$0xf]  ;;  %v2405_v19 = vld [vmem:[%s3266_s11 + $0x4] sm:$0xf]  ;;  %v3296_v38 = vpack.c.bf16 %v324_v31, %v317_v30  ;;  %v2407_v47 = vld [vmem:[%s3266_s11 + $0x8] sm:$0xf]  ;;  %p3072_p1 = scmp.lt.s32.totalorder %s3528_s28, %s3070_s7 }
  0x1a   : > { %v231_v22 = vsel %vm229_vm1, %v222_v18, 0  ;;  %v744_v25 = vsel %vm229_vm1, %v2405_v19, 0  ;;  %v3300_v43 = vpack.c.bf16 %v338_v40, %v331_v39  ;;  %v2409_v48 = vld [vmem:[%s3266_s11 + $0xc] sm:$0xf]  ;;  %v1257_v50 = vsel %vm229_vm1, %v2407_v47, 0  ;;  %p3068_p0 = pneg %p3067_p13  ;;  %s3071_s8 = scalar_lea.vmem %s3070_s7, 512 }
  0x1b   : > { %v3284_v26 = vand.u32 4294901760, %v231_v22  ;;  %v3286_v27 = vand.u32 4294901760, %v744_v25  ;;  %v1770_v51 = vsel %vm229_vm1, %v2409_v48, 0  ;;  %v3370_v52 = vand.u32 4294901760, %v1257_v50  ;;  %p3073_p2 = scmp.lt.s32.totalorder %s3071_s8, %s3065_s5 }
  0x1c   : > { %v3372_v53 = vand.u32 4294901760, %v1770_v51 }
  0x1d   : > { %v303_v28 = vsub.f32 %v231_v22, %v3284_v26  ;;  %v816_v29 = vsub.f32 %v744_v25, %v3286_v27  ;;  %v3381_v54 = vsub.f32 %v1257_v50, %v3370_v52  ;;  %p3074_p3 = por %p3073_p2, %p3072_p1 }
  0x1e   : > { %v3384_v55 = vsub.f32 %v1770_v51, %v3372_v53 }
  0x1f   : > { %v304_v34 = vand.u32 4294901760, %v303_v28  ;;  %v817_v35 = vand.u32 4294901760, %v816_v29  ;;  %v1330_v56 = vand.u32 4294901760, %v3381_v54  ;;  %p3075_p5 = pnand %p3074_p3, %p3068_p0 }
  0x20   : > { %v1843_v57 = vand.u32 4294901760, %v3384_v55 }
  0x21   : > { %v305_v36 = vsub.f32 %v303_v28, %v304_v34  ;;  %v818_v37 = vsub.f32 %v816_v29, %v817_v35  ;;  %v1331_v58 = vsub.f32 %v3381_v54, %v1330_v56 }
  0x22   : > { %v1844_v59 = vsub.f32 %v3384_v55, %v1843_v57 }
  0x23   : > { %v306_v41 = vand.u32 4294901760, %v305_v36  ;;  %v819_v42 = vand.u32 4294901760, %v818_v37  ;;  %v1332_v60 = vand.u32 4294901760, %v1331_v58 }
  0x24   : > { %v1845_v61 = vand.u32 4294901760, %v1844_v59 }
  0x25   : > { %2546 = vmatmul.mubr.f32.vlgmr.msra.gmra.mrb[0].mxu0 %v306_v41  ;;  %2612 = vmatmul.mubr.f32.vlgmr.msra.gmra.mrb[0].mxu1 %v819_v42 }
  0x26   : > { %2809 = vmatpush3.bf16.msra.mxu0 %v3296_v38  ;;  %2845 = vmatpush3.bf16.msra.mxu1 %v3296_v38 }
  0x27   : > { %2810 = vmatprep.subr.bf16.mxu0 %v3145_v3  ;;  %2846 = vmatprep.subr.bf16.mxu1 %v3145_v3 }
  0x28   : > { %2556 = vmatprep.mubr.msk.f32.mxu0 %vm3146_vm0, %v3147_v9  ;;  %2622 = vmatprep.mubr.msk.f32.mxu1 %vm3146_vm0, %v3147_v9 }
  0x2a   : > { %2812 = vmatpush3.bf16.msra.mxu0 %v3300_v43  ;;  %2848 = vmatpush3.bf16.msra.mxu1 %v3300_v43 }
  0x2b   : > { %2813 = vmatprep.subr.bf16.mxu0 %v3145_v3  ;;  %2849 = vmatprep.subr.bf16.mxu1 %v3145_v3 }
  0x2d   : > { %2557 = vmatmul.mubr.f32.vlgmr.msra.gmra.mrb[0].mxu0 %v3284_v26  ;;  %2623 = vmatmul.mubr.f32.vlgmr.msra.gmra.mrb[0].mxu1 %v3286_v27 }
  0x2e   : > { %2815 = vmatpush3.bf16.msra.mxu0 %v3312_v44  ;;  %2851 = vmatpush3.bf16.msra.mxu1 %v3312_v44 }
  0x2f   : > { %2816 = vmatprep.subr.bf16.mxu0 %v3145_v3  ;;  %2852 = vmatprep.subr.bf16.mxu1 %v3145_v3 }
  0x30   : > { %2567 = vmatprep.mubr.msk.f32.mxu0 %vm3146_vm0, %v3147_v9  ;;  %2633 = vmatprep.mubr.msk.f32.mxu1 %vm3146_vm0, %v3147_v9 }
  0x32   : > { %2818 = vmatpush3.bf16.msra.mxu0 %v3322_v45  ;;  %2854 = vmatpush3.bf16.msra.mxu1 %v3322_v45 }
  0x33   : > { %2819 = vmatprep.subr.bf16.mxu0 %v3145_v3  ;;  %2855 = vmatprep.subr.bf16.mxu1 %v3145_v3 }
  0x35   : > { %2568 = vmatmul.mubr.f32.vlgmr.msra.gmra.mrb[0].mxu0 %v303_v28  ;;  %2634 = vmatmul.mubr.f32.vlgmr.msra.gmra.mrb[0].mxu1 %v816_v29 }
  0x36   : > { %2821 = vmatpush3.bf16.msra.mxu0 %v3245_v10  ;;  %2857 = vmatpush3.bf16.msra.mxu1 %v3245_v10 }
  0x37   : > { %2822 = vmatprep.subr.bf16.mxu0 %v3145_v3  ;;  %2858 = vmatprep.subr.bf16.mxu1 %v3145_v3 }
  0x38   : > { %2578 = vmatprep.mubr.msk.f32.mxu0 %vm3146_vm0, %v3147_v9  ;;  %2644 = vmatprep.mubr.msk.f32.mxu1 %vm3146_vm0, %v3147_v9 }
  0x3a   : > { %2824 = vmatpush3.bf16.msra.mxu0 %v3257_v15  ;;  %2860 = vmatpush3.bf16.msra.mxu1 %v3257_v15 }
  0x3b   : > { %2825 = vmatprep.subr.bf16.mxu0 %v3145_v3  ;;  %2861 = vmatprep.subr.bf16.mxu1 %v3145_v3 }
  0x3d   : > { %2579 = vmatmul.mubr.f32.vlgmr.msra.gmra.mrb[0].mxu0 %v304_v34  ;;  %2645 = vmatmul.mubr.f32.vlgmr.msra.gmra.mrb[0].mxu1 %v817_v35 }
  0x3e   : > { %2827 = vmatpush3.bf16.msra.mxu0 %v3348_v46  ;;  %2863 = vmatpush3.bf16.msra.mxu1 %v3348_v46 }
  0x3f   : > { %2828 = vmatprep.subr.bf16.mxu0 %v3145_v3  ;;  %2864 = vmatprep.subr.bf16.mxu1 %v3145_v3 }
  0x40   : > { %2589 = vmatprep.mubr.msk.f32.mxu0 %vm3146_vm0, %v3147_v9  ;;  %2655 = vmatprep.mubr.msk.f32.mxu1 %vm3146_vm0, %v3147_v9 }
  0x42   : > { %2830 = vmatpush3.bf16.msra.mxu0 %v3360_v49  ;;  %2866 = vmatpush3.bf16.msra.mxu1 %v3360_v49 }
  0x43   : > { %2831 = vmatprep.subr.bf16.mxu0 %v3145_v3  ;;  %2867 = vmatprep.subr.bf16.mxu1 %v3145_v3 }
  0x45   : > { %2590 = vmatmul.mubr.f32.vlgmr.msra.gmra.mrb[0].mxu0 %v3284_v26  ;;  %2656 = vmatmul.mubr.f32.vlgmr.msra.gmra.mrb[0].mxu1 %v3286_v27 }
  0x46   : > { %2833 = vmatpush3.bf16.msra.mxu0 %v3245_v10  ;;  %2869 = vmatpush3.bf16.msra.mxu1 %v3245_v10 }
  0x47   : > { %2834 = vmatprep.subr.bf16.mxu0 %v3145_v3  ;;  %2870 = vmatprep.subr.bf16.mxu1 %v3145_v3 }
  0x48   : > { %2600 = vmatprep.mubr.msk.f32.mxu0 %vm3146_vm0, %v3147_v9  ;;  %2666 = vmatprep.mubr.msk.f32.mxu1 %vm3146_vm0, %v3147_v9 }
  0x4a   : > { %2836 = vmatpush3.bf16.msra.mxu0 %v3257_v15  ;;  %2872 = vmatpush3.bf16.msra.mxu1 %v3257_v15 }
  0x4b   : > { %2873 = vmatprep.subr.bf16.mxu0 %v3145_v3  ;;  %2909 = vmatprep.subr.bf16.mxu1 %v3145_v3 }
  0x4d   : > { %2601 = vmatmul.mubr.f32.vlgmr.msra.gmra.mrb[0].mxu0 %v3284_v26  ;;  %2667 = vmatmul.mubr.f32.vlgmr.msra.gmra.mrb[0].mxu1 %v3286_v27 }
  0x4e   : > { %2875 = vmatpush3.bf16.msra.mxu0 %v3245_v10  ;;  %2911 = vmatpush3.bf16.msra.mxu1 %v3245_v10 }
  0x4f   : > { %2876 = vmatprep.subr.bf16.mxu0 %v3145_v3  ;;  %2912 = vmatprep.subr.bf16.mxu1 %v3145_v3 }
  0x50   : > { %2677 = vmatprep.mubr.msk.f32.mxu0 %vm3146_vm0, %v3147_v9  ;;  %2743 = vmatprep.mubr.msk.f32.mxu1 %vm3146_vm0, %v3147_v9 }
  0x52   : > { %2878 = vmatpush3.bf16.msra.mxu0 %v3257_v15  ;;  %2914 = vmatpush3.bf16.msra.mxu1 %v3257_v15 }
  0x53   : > { %2879 = vmatprep.subr.bf16.mxu0 %v3145_v3  ;;  %2915 = vmatprep.subr.bf16.mxu1 %v3145_v3 }
  0x55   : > { %2678 = vmatmul.mubr.f32.vlgmr.msra.gmra.mrb[2].mxu0 %v1332_v60  ;;  %2744 = vmatmul.mubr.f32.vlgmr.msra.gmra.mrb[2].mxu1 %v1845_v61 }
  0x56   : > { %2881 = vmatpush3.bf16.msra.mxu0 %v3296_v38  ;;  %2917 = vmatpush3.bf16.msra.mxu1 %v3296_v38 }
  0x57   : > { %2882 = vmatprep.subr.bf16.mxu0 %v3145_v3  ;;  %2918 = vmatprep.subr.bf16.mxu1 %v3145_v3 }
  0x58   : > { %2688 = vmatprep.mubr.msk.f32.mxu0 %vm3146_vm0, %v3147_v9  ;;  %2754 = vmatprep.mubr.msk.f32.mxu1 %vm3146_vm0, %v3147_v9 }
  0x5a   : > { %2884 = vmatpush3.bf16.msra.mxu0 %v3300_v43  ;;  %2920 = vmatpush3.bf16.msra.mxu1 %v3300_v43 }
  0x5b   : > { %2885 = vmatprep.subr.bf16.mxu0 %v3145_v3  ;;  %2921 = vmatprep.subr.bf16.mxu1 %v3145_v3 }
  0x5d   : > { %2689 = vmatmul.mubr.f32.vlgmr.msra.gmra.mrb[2].mxu0 %v3370_v52  ;;  %2755 = vmatmul.mubr.f32.vlgmr.msra.gmra.mrb[2].mxu1 %v3372_v53 }
  0x5e   : > { %2887 = vmatpush3.bf16.msra.mxu0 %v3312_v44  ;;  %2923 = vmatpush3.bf16.msra.mxu1 %v3312_v44 }
  0x5f   : > { %2888 = vmatprep.subr.bf16.mxu0 %v3145_v3  ;;  %2924 = vmatprep.subr.bf16.mxu1 %v3145_v3 }
  0x60   : > { %2699 = vmatprep.mubr.msk.f32.mxu0 %vm3146_vm0, %v3147_v9  ;;  %2765 = vmatprep.mubr.msk.f32.mxu1 %vm3146_vm0, %v3147_v9 }
  0x62   : > { %2890 = vmatpush3.bf16.msra.mxu0 %v3322_v45  ;;  %2926 = vmatpush3.bf16.msra.mxu1 %v3322_v45 }
  0x63   : > { %2891 = vmatprep.subr.bf16.mxu0 %v3145_v3  ;;  %2927 = vmatprep.subr.bf16.mxu1 %v3145_v3 }
  0x65   : > { %2700 = vmatmul.mubr.f32.vlgmr.msra.gmra.mrb[2].mxu0 %v3381_v54  ;;  %2766 = vmatmul.mubr.f32.vlgmr.msra.gmra.mrb[2].mxu1 %v3384_v55 }
  0x66   : > { %2893 = vmatpush3.bf16.msra.mxu0 %v3245_v10  ;;  %2929 = vmatpush3.bf16.msra.mxu1 %v3245_v10 }
  0x67   : > { %2894 = vmatprep.subr.bf16.mxu0 %v3145_v3  ;;  %2930 = vmatprep.subr.bf16.mxu1 %v3145_v3 }
  0x68   : > { %2710 = vmatprep.mubr.msk.f32.mxu0 %vm3146_vm0, %v3147_v9  ;;  %2776 = vmatprep.mubr.msk.f32.mxu1 %vm3146_vm0, %v3147_v9 }
  0x6a   : > { %2896 = vmatpush3.bf16.msra.mxu0 %v3257_v15  ;;  %2932 = vmatpush3.bf16.msra.mxu1 %v3257_v15 }
  0x6b   : > { %2897 = vmatprep.subr.bf16.mxu0 %v3145_v3  ;;  %2933 = vmatprep.subr.bf16.mxu1 %v3145_v3 }
  0x6d   : > { %2711 = vmatmul.mubr.f32.vlgmr.msra.gmra.mrb[2].mxu0 %v1330_v56  ;;  %2777 = vmatmul.mubr.f32.vlgmr.msra.gmra.mrb[2].mxu1 %v1843_v57 }
  0x6e   : > { %2899 = vmatpush3.bf16.msra.mxu0 %v3348_v46  ;;  %2935 = vmatpush3.bf16.msra.mxu1 %v3348_v46 }
  0x6f   : > { %2900 = vmatprep.subr.bf16.mxu0 %v3145_v3  ;;  %2936 = vmatprep.subr.bf16.mxu1 %v3145_v3 }
  0x70   : > { %2721 = vmatprep.mubr.msk.f32.mxu0 %vm3146_vm0, %v3147_v9  ;;  %2787 = vmatprep.mubr.msk.f32.mxu1 %vm3146_vm0, %v3147_v9 }
  0x72   : > { %2902 = vmatpush3.bf16.msra.mxu0 %v3360_v49  ;;  %2938 = vmatpush3.bf16.msra.mxu1 %v3360_v49 }
  0x73   : > { %2903 = vmatprep.subr.bf16.mxu0 %v3145_v3  ;;  %2939 = vmatprep.subr.bf16.mxu1 %v3145_v3 }
  0x75   : > { %2722 = vmatmul.mubr.f32.vlgmr.msra.gmra.mrb[2].mxu0 %v3370_v52  ;;  %2788 = vmatmul.mubr.f32.vlgmr.msra.gmra.mrb[2].mxu1 %v3372_v53 }
  0x76   : > { %2905 = vmatpush3.bf16.msra.mxu0 %v3245_v10  ;;  %2941 = vmatpush3.bf16.msra.mxu1 %v3245_v10 }
  0x77   : > { %2906 = vmatprep.subr.bf16.mxu0 %v3145_v3  ;;  %2942 = vmatprep.subr.bf16.mxu1 %v3145_v3 }
  0x78   : > { %2732 = vmatprep.mubr.msk.f32.mxu0 %vm3146_vm0, %v3147_v9  ;;  %2798 = vmatprep.mubr.msk.f32.mxu1 %vm3146_vm0, %v3147_v9 }
  0x7a   : > { %2908 = vmatpush3.bf16.msra.mxu0 %v3257_v15  ;;  %2944 = vmatpush3.bf16.msra.mxu1 %v3257_v15 }
  0x7d   : > { %2733 = vmatmul.mubr.f32.vlgmr.msra.gmra.mrb[2].mxu0 %v3370_v52  ;;  %2799 = vmatmul.mubr.f32.vlgmr.msra.gmra.mrb[2].mxu1 %v3372_v53 }
 0x120   : > { %v714_v63 = vpop.f32.mrb[0].mxu0  ;;  %v1227_v0 = vpop.f32.mrb[0].mxu1 }
 0x121   : > { %v3485_v1 = vadd.f32 %v2404_v62, %v714_v63  ;;  %v3487_v2 = vadd.f32 %v2404_v62, %v1227_v0  ;;  %v2602_v3 = vpop.f32.mrb[1].mxu0  ;;  %v2668_v4 = vpop.f32.mrb[1].mxu1 }
 0x123   : > { %v719_v5 = vsel %vm718_vm2, %v3485_v1, -inf  ;;  %v1231_v6 = vsel %vm718_vm2, %v3487_v2, -inf }
 0x124   : > { %v720_v7 = vrot.slane %v719_v5, 4  ;;  %v1232_v8 = vrot.slane %v1231_v6, 4 }
 0x126   : > { %v721_v9 = vmax.f32 %v719_v5, %v720_v7  ;;  %v1233_v10 = vmax.f32 %v1231_v6, %v1232_v8 }
 0x128   : > { %v722_v11 = vrot.slane %v721_v9, 2  ;;  %v1234_v12 = vrot.slane %v1233_v10, 2 }
 0x12a   : > { %v723_v13 = vmax.f32 %v721_v9, %v722_v11  ;;  %v1235_v14 = vmax.f32 %v1233_v10, %v1234_v12 }
 0x12c   : > { %v724_v15 = vrot.slane %v723_v13, 1  ;;  %v1236_v16 = vrot.slane %v1235_v14, 1 }
 0x12e   : > { %v725_v17 = vmax.f32 %v723_v13, %v724_v15  ;;  %v1237_v18 = vmax.f32 %v1235_v14, %v1236_v16 }
 0x130   : > { %v726_v19 = vsub.f32 %v3485_v1, %v725_v17  ;;  %v1238_v20 = vsub.f32 %v3487_v2, %v1237_v18 }
 0x132   : > { %v727_v21 = vmul.f32 1.442695, %v726_v19  ;;  %v1239_v22 = vmul.f32 1.442695, %v1238_v20 }
 0x134   : > { %3049 = vpow2.f32 %v727_v21 }
 0x135   : > { %3051 = vpow2.f32 %v1239_v22 }
 0x13e   : > { %v3050_v23 = vpop.eup %3049 }
 0x13f   : > { %v3052_v24 = vpop.eup %3051  ;;  %v729_v25 = vsel %vm718_vm2, %v3050_v23, 0.0 }
 0x140   : > { %v730_v26 = vrot.slane %v729_v25, 4  ;;  %v1241_v27 = vsel %vm718_vm2, %v3052_v24, 0.0 }
 0x141   : > { %v1242_v28 = vrot.slane %v1241_v27, 4 }
 0x142   : > { %v731_v29 = vadd.f32 %v730_v26, %v729_v25 }
 0x143   : > { %v1243_v30 = vadd.f32 %v1242_v28, %v1241_v27 }
 0x144   : > { %v732_v31 = vrot.slane %v731_v29, 2 }
 0x145   : > { %v1244_v32 = vrot.slane %v1243_v30, 2 }
 0x146   : > { %v733_v33 = vadd.f32 %v732_v31, %v731_v29 }
 0x147   : > { %v1245_v34 = vadd.f32 %v1244_v32, %v1243_v30 }
 0x148   : > { %v734_v35 = vrot.slane %v733_v33, 1 }
 0x149   : > { %v1246_v36 = vrot.slane %v1245_v34, 1 }
 0x14a   : > { %v735_v37 = vadd.f32 %v734_v35, %v733_v33 }
 0x14b   : > { %v1247_v38 = vadd.f32 %v1246_v36, %v1245_v34 }
 0x14c   : > { %3053 = vlog2.f32 %v735_v37 }
 0x14d   : > { %3055 = vlog2.f32 %v1247_v38 }
 0x150   : > { %v1740_v39 = vpop.f32.mrb[2].mxu0  ;;  %v2253_v40 = vpop.f32.mrb[2].mxu1 }
 0x151   : > { %v3497_v41 = vadd.f32 %v2404_v62, %v1740_v39  ;;  %v3499_v42 = vadd.f32 %v2404_v62, %v2253_v40  ;;  %v2734_v43 = vpop.f32.mrb[3].mxu0  ;;  %v2800_v44 = vpop.f32.mrb[3].mxu1 }
 0x153   : > { %v1744_v45 = vsel %vm718_vm2, %v3497_v41, -inf  ;;  %v2257_v46 = vsel %vm718_vm2, %v3499_v42, -inf }
 0x154   : > { %v1745_v47 = vrot.slane %v1744_v45, 4  ;;  %v2258_v48 = vrot.slane %v2257_v46, 4 }
 0x156   : > { %v3054_v49 = vpop.eup %3053  ;;  %v1746_v50 = vmax.f32 %v1744_v45, %v1745_v47  ;;  %v2259_v51 = vmax.f32 %v2257_v46, %v2258_v48 }
 0x157   : > { %v3056_v52 = vpop.eup %3055  ;;  %v737_v53 = vmul.f32 0.6931472, %v3054_v49 }
 0x158   : > { %v1249_v54 = vmul.f32 0.6931472, %v3056_v52  ;;  %v1747_v55 = vrot.slane %v1746_v50, 2  ;;  %v2260_v56 = vrot.slane %v2259_v51, 2 }
 0x159   : > { %v738_v57 = vadd.f32 %v737_v53, %v725_v17 }
 0x15a   : > { %v1250_v58 = vadd.f32 %v1249_v54, %v1237_v18  ;;  %v1748_v59 = vmax.f32 %v1746_v50, %v1747_v55  ;;  %v2261_v60 = vmax.f32 %v2259_v51, %v2260_v56 }
 0x15b   : > { %v739_v61 = vsub.f32 %v3485_v1, %v738_v57 }
 0x15c   : > { %v1251_v62 = vsub.f32 %v3487_v2, %v1250_v58  ;;  %v1749_v63 = vrot.slane %v1748_v59, 1  ;;  %v2262_v0 = vrot.slane %v2261_v60, 1 }
 0x15d   : > { %740 = vst.msk [vmem:[%s3510_s26] sm:$0xf] %vm718_vm2, %v739_v61 }
 0x15e   : > { %2406 = vst.msk [vmem:[%s3510_s26 + $0x4] sm:$0xf] %vm718_vm2, %v1251_v62  ;;  %v1750_v3 = vmax.f32 %v1748_v59, %v1749_v63  ;;  %v2263_v4 = vmax.f32 %v2261_v60, %v2262_v0 }
 0x160   : > { %v1751_v5 = vsub.f32 %v3497_v41, %v1750_v3  ;;  %v2264_v6 = vsub.f32 %v3499_v42, %v2263_v4 }
 0x162   : > { %v1752_v7 = vmul.f32 1.442695, %v1751_v5  ;;  %v2265_v1 = vmul.f32 1.442695, %v2264_v6 }
 0x164   : > { %3057 = vpow2.f32 %v1752_v7 }
 0x165   : > { %3059 = vpow2.f32 %v2265_v1 }
 0x16e   : > { %v3058_v2 = vpop.eup %3057 }
 0x16f   : > { %v3060_v8 = vpop.eup %3059  ;;  %v1754_v9 = vsel %vm718_vm2, %v3058_v2, 0.0 }
 0x170   : > { %v1755_v10 = vrot.slane %v1754_v9, 4  ;;  %v2267_v11 = vsel %vm718_vm2, %v3060_v8, 0.0 }
 0x171   : > { %v2268_v12 = vrot.slane %v2267_v11, 4 }
 0x172   : > { %v1756_v13 = vadd.f32 %v1755_v10, %v1754_v9 }
 0x173   : > { %v2269_v14 = vadd.f32 %v2268_v12, %v2267_v11 }
 0x174   : > { %v1757_v15 = vrot.slane %v1756_v13, 2 }
 0x175   : > { %v2270_v16 = vrot.slane %v2269_v14, 2 }
 0x176   : > { %v1758_v17 = vadd.f32 %v1757_v15, %v1756_v13 }
 0x177   : > { %v2271_v18 = vadd.f32 %v2270_v16, %v2269_v14 }
 0x178   : > { %v1759_v19 = vrot.slane %v1758_v17, 1 }
 0x179   : > { %v2272_v20 = vrot.slane %v2271_v18, 1 }
 0x17a   : > { %v1760_v21 = vadd.f32 %v1759_v19, %v1758_v17 }
 0x17b   : > { %v2273_v22 = vadd.f32 %v2272_v20, %v2271_v18 }
 0x17c   : > { %3061 = vlog2.f32 %v1760_v21 }
 0x17d   : > { %3063 = vlog2.f32 %v2273_v22 }
 0x186   : > { %v3062_v23 = vpop.eup %3061 }
 0x187   : > { %v3064_v24 = vpop.eup %3063  ;;  %v1762_v25 = vmul.f32 0.6931472, %v3062_v23 }
 0x188   : > { %v2275_v26 = vmul.f32 0.6931472, %v3064_v24 }
 0x189   : > { %v1763_v27 = vadd.f32 %v1762_v25, %v1750_v3 }
 0x18a   : > { %v2276_v28 = vadd.f32 %v2275_v26, %v2263_v4 }
 0x18b   : > { %v1764_v29 = vsub.f32 %v3497_v41, %v1763_v27 }
 0x18c   : > { %v2277_v30 = vsub.f32 %v3499_v42, %v2276_v28 }
 0x18d   : > { %2408 = vst.msk [vmem:[%s3510_s26 + $0x8] sm:$0xf] %vm718_vm2, %v1764_v29 }
 0x18e   : > { %2410 = vst.msk [vmem:[%s3510_s26 + $0xc] sm:$0xf] %vm718_vm2, %v2277_v30 }
 0x18f   : > { %3078 = shalt.err (!%p3075_p5)
}
 0x190   : > { %s3079_s9 = scalar_lea.hbm %s3526_s4, 256  ;;  %s3083_s18 = scalar_lea.hbm %s3586_s3, 512 }
 0x191   : > { %p3080_p6 = scmp.ne.s32.totalorder %s3526_s4, %s3079_s9  ;;  %p3084_p10 = scmp.lt.u32.totalorder %s3526_s4, %s3586_s3 }
 0x192   : > { %p3085_p11 = scmp.lt.u32.totalorder %s3083_s18, %s3079_s9  ;;  %p3087_p13 = scmp.lt.u32.totalorder %s3079_s9, %s3526_s4 }
 0x193   : > { %p3081_p7 = pnand %p3080_p6, %p3211_p4 }
 0x194   : > { %p3086_p12 = por %p3085_p11, %p3084_p10 }
 0x195   : > { %p3082_p9 = pneg %p3081_p7 }
 0x196   : > { %p3088_p0 = por %p3087_p13, %p3086_p12 }
 0x198   : > { %p3089_p1 = pnand %p3088_p0, %p3082_p9 }
 0x19a   : > { %3092 = shalt.err (!%p3089_p1)
}
 0x19b   : > { %s3149_s23 = smov 64   ;;  %s3150_s26 = smov 4  }
 0x19c   : > { %2989 = dma.vmem_to_hbm [thread:$0]  (%p3211_p4), %s3528_s28, 256, %s3526_s4, %s3537_s15, %s3149_s23, %s3149_s23, %s3150_s26  }
 0x19d PF: > { %p2995_p2 = scmp.ge.s32.totalorder %s3143_s17, 2  ;;  %s2310_s27 = sand.u32 1, %s3123_s12  }
 0x19e   : > { %s2311_s29 = scalar_lea.sflag [#allocation3], %s2310_s27 }
 0x19f   : > { %p2992_p3 = pnand %p2995_p2, %p3218_p8 }
 0x1a1   : > { %3118 = dma.done.wait (!%p2992_p3), %s2311_s29, 256  }
 0x1a2   : > { %3120 = vsyncadd (!%p2992_p3), %s2311_s29, 4294967040  ;;  %s16_s17 = sadd.s32 1, %s3143_s17   ;;  %s3589_s12 = smov %s3127_s13 }
 0x1a3   : > { %p13_p5 = scmp.ge.s32.totalorder %s16_s17, 4   ;;  %s3590_s13 = smov %s3131_s14 }
 0x1a4   : > { %s3591_s14 = smov %s3224_s25  ;;  %s3592_s15 = smov %s3139_s16 }
 0x1a5   : > { %s3593_s16 = smov %s3595_s20  ;;  %15 = sbr.rel (!%p13_p5) target bundleno = 4 (0x4), region = 79 }
 0x1ac   :  { %2316 = vsyncpa [#allocation3], 1 }
 0x1ad   :  { %2318 = vsyncpa [#allocation3 + $0x1], 1 }

// kernel: _lambda_.2
= control target key start
LH: loop header
LB: loop body
LE: loop exit
PB: predicated region body
PF: predicated region fallthrough
CT: control target
= control target key end

     0   :  { %11 = vsyncpa [#allocation4], 0  ;;  %s3133_s18 = smov 0   ;;  %s3413_s0 = inlined_call_operand.vmem [shape: f32[8,4,96], index: 0, kind: input, shape index: {}]   ;;  %s3414_s1 = inlined_call_operand.vmem [shape: f32[1,4,32], index: 1, kind: input, shape index: {}]   ;;  %s3415_s2 = inlined_call_operand.vmem [shape: f32[32,96], index: 2, kind: input, shape index: {}]   ;;  %s3416_s3 = inlined_call_operand.vmem [shape: f32[1,96], index: 3, kind: input, shape index: {}]   ;;  %s3417_s4 = inlined_call_operand.vmem [shape: f32[8,4,32], index: 4, kind: output, shape index: {0}]   ;;  %s3418_s5 = inlined_call_operand.hbm [shape: f32[1,4,32], index: 5, kind: output, shape index: {1}]  }
   0x1 LB: > { %s3139_s19 = sadd.s32 4294967295, %s3094_s18   ;;  %p2420_p0 = scmp.ge.s32.totalorder %s3094_s18, 1  ;;  %s3094_s18 = sphi %s3133_s18, %s17_s18  }
   0x2   : > { %p187_p1 = scmp.lt.s32.totalorder %s3094_s18, 3 }
   0x4   : > { %p188_p2 = pnand %p2420_p0, %p187_p1 }
   0x5   : > { %s2421_s20 = sshll.u32 (!%p188_p2), %s3139_s19, 2  ;;  %p2425_p4 = scmp.ne.s32.totalorder (!%p188_p2), %s3139_s19, 0 }
   0x6   : > { %191 = sbr.rel (%p188_p2) target bundleno = 3019 (0xbcb), region = 36  ;;  %p216_p3 = scmp.lt.s32.totalorder (!%p188_p2), %s2421_s20, 7 }
   0xd   : > { %s3420_s20 = smov (!%p216_p3, %s2421_s20), 7  ;;  %230 = sbr.rel (%p2425_p4) target bundleno = 20 (0x14), region = 40 }
   0xe   : > { %s2422_s21 = sshll.u32 %s3420_s20, 2  ;;  %v231_v0 = vld [vmem:[%s3414_s1] sm:$0xf] (!%p2425_p4)  ;;  %vm232_vm0 = vcmask (!%p2425_p4), 257024  }
   0xf   : > { %s3147_s24 = scalar_lea.vmem %s3413_s0, %s2422_s21  ;;  %s3152_s27 = scalar_lea.vmem %s3417_s4, %s2422_s21  ;;  %233 = vst.msk [vmem:[#allocation2] sm:$0xf] (!%p2425_p4), %vm232_vm0, %v231_v0 }
  0x14 PF: > { %v234_v1 = vld [vmem:[%s3415_s2] sm:$0xff]  ;;  %v235_v2 = vld [vmem:[%s3415_s2 + $0x8] sm:$0xff]  ;;  %v236_v3 = vld [vmem:[%s3415_s2 + $0x10] sm:$0xff]  ;;  %v3096_v4 = vmov 0.0|0.0   ;;  %vm3097_vm1 = vmmov 0   ;;  %v3098_v9 = vmov 0.0  }
  0x15   : > { %2825 = vmatprep.subr.bf16.mxu0 %v3096_v4  ;;  %v252_v5 = vand.u32 4294901760, %v234_v1  ;;  %v255_v6 = vand.u32 4294901760, %v235_v2  ;;  %v237_v7 = vld [vmem:[%s3415_s2 + $0x18] sm:$0xff]  ;;  %v258_v8 = vand.u32 4294901760, %v236_v3  ;;  %2569 = vmatprep.mubr.msk.f32.mxu0 %vm3097_vm1, %v3098_v9  ;;  %vm247_vm2 = vcmask 261120   ;;  %s3099_s15 = smov 64  }
  0x16   : > { %v3173_v10 = vld [vmem:[#allocation2] sm:$0xf]  ;;  %v261_v11 = vand.u32 4294901760, %v237_v7  ;;  %2861 = vmatprep.subr.bf16.mxu1 %v3096_v4  ;;  %2635 = vmatprep.mubr.msk.f32.mxu1 %vm3097_vm1, %v3098_v9  ;;  %s3100_s16 = smov 96   ;;  %s3101_s17 = smov 32   ;;  %vm769_vm3 = vcmask 257024  }
  0x17   : > { %v3178_v12 = vpack.c.bf16 %v255_v6, %v252_v5  ;;  %v249_v13 = vsel %vm247_vm2, %v3173_v10, 0  ;;  %v332_v14 = vsub.f32 %v234_v1, %v252_v5  ;;  %v339_v15 = vsub.f32 %v235_v2, %v255_v6  ;;  %v3249_v42 = vld [vmem:[%s3416_s3] ss:$0 sm:$0xff]  ;;  %s3102_s20 = smov [#allocation3]   ;;  %p3017_p5 = scmp.eq.s32.totalorder %s3139_s19, 1 }
  0x18   : > { %v3182_v16 = vand.u32 4294901760, %v249_v13  ;;  %v346_v17 = vsub.f32 %v236_v3, %v258_v8  ;;  %v353_v18 = vsub.f32 %v237_v7, %v261_v11  ;;  %v3185_v19 = vpack.c.bf16 %v261_v11, %v258_v8  ;;  %v240_v46 = vld [vmem:[%s3147_s24] sm:$0xf]  ;;  %v2428_v11 = vld [vmem:[%s3147_s24 + $0x4] sm:$0xf]  ;;  %s2352_s21 = sshll.u32 %s3102_s20, 4  ;;  %s2353_s21 = int_to_ptr.vmem [resolvable:$true] %s2352_s21 }
  0x19   : > { %2827 = vmatpush3.bf16.msra.mxu0 %v3178_v12  ;;  %v333_v20 = vand.u32 4294901760, %v332_v14  ;;  %v340_v21 = vand.u32 4294901760, %v339_v15  ;;  %2863 = vmatpush3.bf16.msra.mxu1 %v3178_v12  ;;  %v3204_v38 = vpack.c.bf16 %v339_v15, %v332_v14  ;;  %s3058_s22 = scalar_lea.vmem %s2353_s21, 64  ;;  %p3065_p9 = scmp.lt.s32.totalorder %s2353_s21, %s2353_s21 }
  0x1a   : > { %2828 = vmatprep.subr.bf16.mxu0 %v3096_v4  ;;  %v321_v22 = vsub.f32 %v249_v13, %v3182_v16  ;;  %v347_v23 = vand.u32 4294901760, %v346_v17  ;;  %v354_v24 = vand.u32 4294901760, %v353_v18  ;;  %2864 = vmatprep.subr.bf16.mxu1 %v3096_v4  ;;  %v3209_v39 = vpack.c.bf16 %v353_v18, %v346_v17  ;;  %p3059_p6 = scmp.ne.s32.totalorder %s2353_s21, %s3058_s22  ;;  %p3066_p10 = scmp.lt.s32.totalorder %s3058_s22, %s3058_s22 }
  0x1b   : > { %v334_v25 = vsub.f32 %v332_v14, %v333_v20  ;;  %v341_v26 = vsub.f32 %v339_v15, %v340_v21  ;;  %v3221_v40 = vpack.c.bf16 %v340_v21, %v333_v20 }
  0x1c   : > { %v322_v27 = vand.u32 4294901760, %v321_v22  ;;  %v348_v28 = vsub.f32 %v346_v17, %v347_v23  ;;  %v355_v29 = vsub.f32 %v353_v18, %v354_v24  ;;  %v3225_v41 = vpack.c.bf16 %v354_v24, %v347_v23  ;;  %p3060_p7 = pnand %p3059_p6, %p3017_p5  ;;  %p3067_p11 = por %p3066_p10, %p3065_p9 }
  0x1d   : > { %2830 = vmatpush3.bf16.msra.mxu0 %v3185_v19  ;;  %v335_v30 = vand.u32 4294901760, %v334_v25  ;;  %v342_v31 = vand.u32 4294901760, %v341_v26  ;;  %2866 = vmatpush3.bf16.msra.mxu1 %v3185_v19 }
  0x1e   : > { %v323_v32 = vsub.f32 %v321_v22, %v322_v27  ;;  %2831 = vmatprep.subr.bf16.mxu0 %v3096_v4  ;;  %2867 = vmatprep.subr.bf16.mxu1 %v3096_v4  ;;  %v349_v34 = vand.u32 4294901760, %v348_v28  ;;  %v356_v35 = vand.u32 4294901760, %v355_v29  ;;  %p3061_p8 = pneg %p3060_p7 }
  0x1f   : > { %v3195_v33 = vpack.c.bf16 %v342_v31, %v335_v30 }
  0x20   : > { %v324_v36 = vand.u32 4294901760, %v323_v32  ;;  %v3198_v37 = vpack.c.bf16 %v356_v35, %v349_v34  ;;  %p3068_p12 = pnand %p3067_p11, %p3061_p8 }
  0x22   : > { %2570 = vmatmul.mubr.f32.vlgmr.msra.gmra.mrb[0].mxu0 %v324_v36 }
  0x23   : > { %2833 = vmatpush3.bf16.msra.mxu0 %v3195_v33  ;;  %2580 = vmatprep.mubr.msk.f32.mxu0 %vm3097_vm1, %v3098_v9 }
  0x24   : > { %2834 = vmatprep.subr.bf16.mxu0 %v3096_v4 }
  0x27   : > { %2836 = vmatpush3.bf16.msra.mxu0 %v3198_v37 }
  0x28   : > { %2837 = vmatprep.subr.bf16.mxu0 %v3096_v4 }
  0x2a   : > { %2581 = vmatmul.mubr.f32.vlgmr.msra.gmra.mrb[0].mxu0 %v3182_v16 }
  0x2b   : > { %2839 = vmatpush3.bf16.msra.mxu0 %v3204_v38  ;;  %2591 = vmatprep.mubr.msk.f32.mxu0 %vm3097_vm1, %v3098_v9 }
  0x2c   : > { %2840 = vmatprep.subr.bf16.mxu0 %v3096_v4 }
  0x2f   : > { %2842 = vmatpush3.bf16.msra.mxu0 %v3209_v39 }
  0x30   : > { %2843 = vmatprep.subr.bf16.mxu0 %v3096_v4 }
  0x32   : > { %2592 = vmatmul.mubr.f32.vlgmr.msra.gmra.mrb[0].mxu0 %v321_v22 }
  0x33   : > { %2845 = vmatpush3.bf16.msra.mxu0 %v3178_v12  ;;  %2602 = vmatprep.mubr.msk.f32.mxu0 %vm3097_vm1, %v3098_v9 }
  0x34   : > { %2846 = vmatprep.subr.bf16.mxu0 %v3096_v4 }
  0x37   : > { %2848 = vmatpush3.bf16.msra.mxu0 %v3185_v19 }
  0x38   : > { %2849 = vmatprep.subr.bf16.mxu0 %v3096_v4 }
  0x3a   : > { %2603 = vmatmul.mubr.f32.vlgmr.msra.gmra.mrb[0].mxu0 %v322_v27 }
  0x3b   : > { %2851 = vmatpush3.bf16.msra.mxu0 %v3221_v40  ;;  %2613 = vmatprep.mubr.msk.f32.mxu0 %vm3097_vm1, %v3098_v9 }
  0x3c   : > { %2852 = vmatprep.subr.bf16.mxu0 %v3096_v4 }
  0x3f   : > { %2854 = vmatpush3.bf16.msra.mxu0 %v3225_v41 }
  0x40   : > { %2855 = vmatprep.subr.bf16.mxu0 %v3096_v4 }
  0x42   : > { %2614 = vmatmul.mubr.f32.vlgmr.msra.gmra.mrb[0].mxu0 %v3182_v16 }
  0x43   : > { %2857 = vmatpush3.bf16.msra.mxu0 %v3178_v12  ;;  %2624 = vmatprep.mubr.msk.f32.mxu0 %vm3097_vm1, %v3098_v9 }
  0x44   : > { %2858 = vmatprep.subr.bf16.mxu0 %v3096_v4 }
  0x47   : > { %2860 = vmatpush3.bf16.msra.mxu0 %v3185_v19 }
  0x48   : > { %2897 = vmatprep.subr.bf16.mxu0 %v3096_v4 }
  0x4a   : > { %2625 = vmatmul.mubr.f32.vlgmr.msra.gmra.mrb[0].mxu0 %v3182_v16 }
  0x4b   : > { %2899 = vmatpush3.bf16.msra.mxu0 %v3178_v12  ;;  %2701 = vmatprep.mubr.msk.f32.mxu0 %vm3097_vm1, %v3098_v9 }
  0x4c   : > { %2900 = vmatprep.subr.bf16.mxu0 %v3096_v4 }
  0x4f   : > { %2902 = vmatpush3.bf16.msra.mxu0 %v3185_v19 }
  0x50   : > { %2903 = vmatprep.subr.bf16.mxu0 %v3096_v4 }
 0x11d   : > { %v732_v43 = vpop.f32.mrb[0].mxu0 }
 0x11e   : > { %v2969_v44 = vadd.f32 %v3249_v42, %v732_v43  ;;  %v2626_v45 = vpop.f32.mrb[1].mxu0 }
 0x120   : > { %744 = vrot.lane.b32.xlu0 %v2969_v44, %s3099_s15  ;;  %v736_v47 = vadd.f32 %v2969_v44, %v240_v46 }
 0x122   : > { %v2427_v48 = vmul.f32 -1.442695, %v736_v47 }
 0x124   : > { %3034 = vpow2.f32 %v2427_v48 }
 0x12e   : > { %v3035_v49 = vpop.eup %3034 }
 0x12f   : > { %v740_v50 = vadd.f32 1.0, %v3035_v49 }
 0x131   : > { %3036 = vrcp.f32 %v740_v50 }
 0x13b   : > { %v3037_v51 = vpop.eup %3036 }
 0x13c   : > { %v754_v58 = vsub.f32 1.0, %v3037_v51 }
 0x192   : > { %v745_v52 = vpop.permute.xlu0 %744 }
 0x193   : > { %v747_v53 = vmul.f32 %v3037_v51, %v745_v52 }
 0x195   : > { %749 = vrot.lane.b32.xlu0 %v747_v53, %s3099_s15 }
 0x207   : > { %v750_v54 = vpop.permute.xlu0 %749 }
 0x208   : > { %v752_v55 = vadd.f32 %v750_v54, %v240_v46  ;;  %v2431_v46 = vld [vmem:[%s3147_s24 + $0x8] sm:$0xf] }
 0x20a   : > { %3038 = vtanh.f32 %v752_v55 }
 0x214   : > { %v3039_v56 = vpop.eup %3038 }
 0x215   : > { %756 = vrot.lane.b32.xlu1 %v3039_v56, %s3100_s16 }
 0x219   : > { %760 = vrot.lane.b32.xlu1 %v3173_v10, %s3101_s17 }
 0x287   : > { %v757_v57 = vpop.permute.xlu1 %756 }
 0x288   : > { %v759_v60 = vmul.f32 %v757_v57, %v754_v58 }
 0x28b   : > { %v761_v59 = vpop.permute.xlu1 %760 }
 0x28c   : > { %v763_v61 = vmul.f32 %v3037_v51, %v761_v59 }
 0x28e   : > { %v3257_v62 = vadd.f32 %v763_v61, %v759_v60 }
 0x290   : > { %766 = vrot.lane.b32.xlu0 %v3257_v62, %s3100_s16 }
 0x302   : > { %v767_v63 = vpop.permute.xlu0 %766 }
 0x303   : > { %770 = vst.msk [vmem:[%s3152_s27] sm:$0xf] %vm769_vm3, %v767_v63  ;;  %v773_v0 = vsel %vm247_vm2, %v767_v63, 0 }
 0x304   : > { %v844_v1 = vand.u32 4294901760, %v773_v0 }
 0x306   : > { %v845_v2 = vsub.f32 %v773_v0, %v844_v1 }
 0x308   : > { %v846_v3 = vand.u32 4294901760, %v845_v2 }
 0x30a   : > { %v847_v5 = vsub.f32 %v845_v2, %v846_v3 }
 0x30c   : > { %v848_v6 = vand.u32 4294901760, %v847_v5 }
 0x30e   : > { %2636 = vmatmul.mubr.f32.vlgmr.msra.gmra.mrb[0].mxu1 %v848_v6 }
 0x30f   : > { %2869 = vmatpush3.bf16.msra.mxu1 %v3195_v33  ;;  %2646 = vmatprep.mubr.msk.f32.mxu1 %vm3097_vm1, %v3098_v9 }
 0x310   : > { %2870 = vmatprep.subr.bf16.mxu1 %v3096_v4 }
 0x313   : > { %2872 = vmatpush3.bf16.msra.mxu1 %v3198_v37 }
 0x314   : > { %2873 = vmatprep.subr.bf16.mxu1 %v3096_v4 }
 0x316   : > { %2647 = vmatmul.mubr.f32.vlgmr.msra.gmra.mrb[0].mxu1 %v844_v1 }
 0x317   : > { %2875 = vmatpush3.bf16.msra.mxu1 %v3204_v38  ;;  %2657 = vmatprep.mubr.msk.f32.mxu1 %vm3097_vm1, %v3098_v9 }
 0x318   : > { %2876 = vmatprep.subr.bf16.mxu1 %v3096_v4 }
 0x31b   : > { %2878 = vmatpush3.bf16.msra.mxu1 %v3209_v39 }
 0x31c   : > { %2879 = vmatprep.subr.bf16.mxu1 %v3096_v4 }
 0x31e   : > { %2658 = vmatmul.mubr.f32.vlgmr.msra.gmra.mrb[0].mxu1 %v845_v2 }
 0x31f   : > { %2881 = vmatpush3.bf16.msra.mxu1 %v3178_v12  ;;  %2668 = vmatprep.mubr.msk.f32.mxu1 %vm3097_vm1, %v3098_v9 }
 0x320   : > { %2882 = vmatprep.subr.bf16.mxu1 %v3096_v4 }
 0x323   : > { %2884 = vmatpush3.bf16.msra.mxu1 %v3185_v19 }
 0x324   : > { %2885 = vmatprep.subr.bf16.mxu1 %v3096_v4 }
 0x326   : > { %2669 = vmatmul.mubr.f32.vlgmr.msra.gmra.mrb[0].mxu1 %v846_v3 }
 0x327   : > { %2887 = vmatpush3.bf16.msra.mxu1 %v3221_v40  ;;  %2679 = vmatprep.mubr.msk.f32.mxu1 %vm3097_vm1, %v3098_v9 }
 0x328   : > { %2888 = vmatprep.subr.bf16.mxu1 %v3096_v4 }
 0x32b   : > { %2890 = vmatpush3.bf16.msra.mxu1 %v3225_v41 }
 0x32c   : > { %2891 = vmatprep.subr.bf16.mxu1 %v3096_v4 }
 0x32e   : > { %2680 = vmatmul.mubr.f32.vlgmr.msra.gmra.mrb[0].mxu1 %v844_v1 }
 0x32f   : > { %2893 = vmatpush3.bf16.msra.mxu1 %v3178_v12  ;;  %2690 = vmatprep.mubr.msk.f32.mxu1 %vm3097_vm1, %v3098_v9 }
 0x330   : > { %2894 = vmatprep.subr.bf16.mxu1 %v3096_v4 }
 0x333   : > { %2896 = vmatpush3.bf16.msra.mxu1 %v3185_v19 }
 0x334   : > { %2933 = vmatprep.subr.bf16.mxu1 %v3096_v4 }
 0x336   : > { %2691 = vmatmul.mubr.f32.vlgmr.msra.gmra.mrb[0].mxu1 %v844_v1 }
 0x337   : > { %2935 = vmatpush3.bf16.msra.mxu1 %v3178_v12  ;;  %2767 = vmatprep.mubr.msk.f32.mxu1 %vm3097_vm1, %v3098_v9 }
 0x338   : > { %2936 = vmatprep.subr.bf16.mxu1 %v3096_v4 }
 0x33b   : > { %2938 = vmatpush3.bf16.msra.mxu1 %v3185_v19 }
 0x33c   : > { %2939 = vmatprep.subr.bf16.mxu1 %v3096_v4 }
 0x409   : > { %v1256_v7 = vpop.f32.mrb[0].mxu1 }
 0x40a   : > { %v2970_v8 = vadd.f32 %v3249_v42, %v1256_v7  ;;  %v2692_v10 = vpop.f32.mrb[1].mxu1 }
 0x40c   : > { %1268 = vrot.lane.b32.xlu1 %v2970_v8, %s3099_s15  ;;  %v1260_v13 = vadd.f32 %v2970_v8, %v2428_v11 }
 0x40e   : > { %v2429_v14 = vmul.f32 -1.442695, %v1260_v13 }
 0x410   : > { %3040 = vpow2.f32 %v2429_v14 }
 0x41a   : > { %v3041_v15 = vpop.eup %3040 }
 0x41b   : > { %v1264_v16 = vadd.f32 1.0, %v3041_v15 }
 0x41d   : > { %3042 = vrcp.f32 %v1264_v16 }
 0x427   : > { %v3043_v17 = vpop.eup %3042 }
 0x428   : > { %v1278_v24 = vsub.f32 1.0, %v3043_v17  ;;  %v1284_v26 = vmul.f32 %v3043_v17, %v3257_v62 }
 0x47e   : > { %v1269_v18 = vpop.permute.xlu1 %1268 }
 0x47f   : > { %v1271_v20 = vmul.f32 %v3043_v17, %v1269_v18 }
 0x481   : > { %1273 = vrot.lane.b32.xlu0 %v1271_v20, %s3099_s15 }
 0x4f3   : > { %v1274_v21 = vpop.permute.xlu0 %1273 }
 0x4f4   : > { %v1276_v22 = vadd.f32 %v2428_v11, %v1274_v21 }
 0x4f6   : > { %3044 = vtanh.f32 %v1276_v22 }
 0x500   : > { %v3045_v23 = vpop.eup %3044 }
 0x501   : > { %1280 = vrot.lane.b32.xlu1 %v3045_v23, %s3100_s16 }
 0x573   : > { %v1281_v25 = vpop.permute.xlu1 %1280 }
 0x574   : > { %v1283_v27 = vmul.f32 %v1281_v25, %v1278_v24 }
 0x576   : > { %v1285_v28 = vadd.f32 %v1284_v26, %v1283_v27 }
 0x578   : > { %1287 = vrot.lane.b32.xlu0 %v1285_v28, %s3100_s16 }
 0x5ea   : > { %v1288_v29 = vpop.permute.xlu0 %1287 }
 0x5eb   : > { %2430 = vst.msk [vmem:[%s3152_s27 + $0x4] sm:$0xf] %vm769_vm3, %v1288_v29  ;;  %v1294_v30 = vsel %vm247_vm2, %v1288_v29, 0 }
 0x5ec   : > { %v1365_v31 = vand.u32 4294901760, %v1294_v30 }
 0x5ee   : > { %v1366_v32 = vsub.f32 %v1294_v30, %v1365_v31 }
 0x5f0   : > { %v1367_v34 = vand.u32 4294901760, %v1366_v32 }
 0x5f2   : > { %v1368_v35 = vsub.f32 %v1366_v32, %v1367_v34 }
 0x5f4   : > { %v1369_v36 = vand.u32 4294901760, %v1368_v35 }
 0x5f6   : > { %2702 = vmatmul.mubr.f32.vlgmr.msra.gmra.mrb[2].mxu0 %v1369_v36 }
 0x5f7   : > { %2905 = vmatpush3.bf16.msra.mxu0 %v3195_v33  ;;  %2712 = vmatprep.mubr.msk.f32.mxu0 %vm3097_vm1, %v3098_v9 }
 0x5f8   : > { %2906 = vmatprep.subr.bf16.mxu0 %v3096_v4 }
 0x5fb   : > { %2908 = vmatpush3.bf16.msra.mxu0 %v3198_v37 }
 0x5fc   : > { %2909 = vmatprep.subr.bf16.mxu0 %v3096_v4 }
 0x5fe   : > { %2713 = vmatmul.mubr.f32.vlgmr.msra.gmra.mrb[2].mxu0 %v1365_v31 }
 0x5ff   : > { %2911 = vmatpush3.bf16.msra.mxu0 %v3204_v38  ;;  %2723 = vmatprep.mubr.msk.f32.mxu0 %vm3097_vm1, %v3098_v9 }
 0x600   : > { %2912 = vmatprep.subr.bf16.mxu0 %v3096_v4 }
 0x603   : > { %2914 = vmatpush3.bf16.msra.mxu0 %v3209_v39 }
 0x604   : > { %2915 = vmatprep.subr.bf16.mxu0 %v3096_v4 }
 0x606   : > { %2724 = vmatmul.mubr.f32.vlgmr.msra.gmra.mrb[2].mxu0 %v1366_v32 }
 0x607   : > { %2917 = vmatpush3.bf16.msra.mxu0 %v3178_v12  ;;  %2734 = vmatprep.mubr.msk.f32.mxu0 %vm3097_vm1, %v3098_v9 }
 0x608   : > { %2918 = vmatprep.subr.bf16.mxu0 %v3096_v4 }
 0x60b   : > { %2920 = vmatpush3.bf16.msra.mxu0 %v3185_v19 }
 0x60c   : > { %2921 = vmatprep.subr.bf16.mxu0 %v3096_v4 }
 0x60e   : > { %2735 = vmatmul.mubr.f32.vlgmr.msra.gmra.mrb[2].mxu0 %v1367_v34 }
 0x60f   : > { %2923 = vmatpush3.bf16.msra.mxu0 %v3221_v40  ;;  %2745 = vmatprep.mubr.msk.f32.mxu0 %vm3097_vm1, %v3098_v9 }
 0x610   : > { %2924 = vmatprep.subr.bf16.mxu0 %v3096_v4 }
 0x613   : > { %2926 = vmatpush3.bf16.msra.mxu0 %v3225_v41 }
 0x614   : > { %2927 = vmatprep.subr.bf16.mxu0 %v3096_v4 }
 0x616   : > { %2746 = vmatmul.mubr.f32.vlgmr.msra.gmra.mrb[2].mxu0 %v1365_v31 }
 0x617   : > { %2929 = vmatpush3.bf16.msra.mxu0 %v3178_v12  ;;  %2756 = vmatprep.mubr.msk.f32.mxu0 %vm3097_vm1, %v3098_v9 }
 0x618   : > { %2930 = vmatprep.subr.bf16.mxu0 %v3096_v4 }
 0x61b   : > { %2932 = vmatpush3.bf16.msra.mxu0 %v3185_v19 }
 0x61e   : > { %2757 = vmatmul.mubr.f32.vlgmr.msra.gmra.mrb[2].mxu0 %v1365_v31 }
 0x6f1   : > { %v1777_v43 = vpop.f32.mrb[2].mxu0 }
 0x6f2   : > { %v2971_v44 = vadd.f32 %v3249_v42, %v1777_v43  ;;  %v2758_v45 = vpop.f32.mrb[3].mxu0 }
 0x6f4   : > { %1789 = vrot.lane.b32.xlu1 %v2971_v44, %s3099_s15  ;;  %v1781_v47 = vadd.f32 %v2971_v44, %v2431_v46 }
 0x6f6   : > { %v2432_v48 = vmul.f32 -1.442695, %v1781_v47 }
 0x6f8   : > { %3046 = vpow2.f32 %v2432_v48 }
 0x702   : > { %v3047_v49 = vpop.eup %3046 }
 0x703   : > { %v1785_v50 = vadd.f32 1.0, %v3047_v49 }
 0x705   : > { %3048 = vrcp.f32 %v1785_v50 }
 0x70f   : > { %v3049_v51 = vpop.eup %3048 }
 0x710   : > { %v1799_v57 = vsub.f32 1.0, %v3049_v51  ;;  %v1805_v59 = vmul.f32 %v3049_v51, %v1285_v28 }
 0x766   : > { %v1790_v52 = vpop.permute.xlu1 %1789 }
 0x767   : > { %v1792_v53 = vmul.f32 %v3049_v51, %v1790_v52 }
 0x769   : > { %1794 = vrot.lane.b32.xlu0 %v1792_v53, %s3099_s15 }
 0x7db   : > { %v1795_v54 = vpop.permute.xlu0 %1794 }
 0x7dc   : > { %v1797_v55 = vadd.f32 %v2431_v46, %v1795_v54 }
 0x7de   : > { %3050 = vtanh.f32 %v1797_v55 }
 0x7e8   : > { %v3051_v56 = vpop.eup %3050 }
 0x7e9   : > { %1801 = vrot.lane.b32.xlu1 %v3051_v56, %s3100_s16 }
 0x85b   : > { %v1802_v58 = vpop.permute.xlu1 %1801 }
 0x85c   : > { %v1804_v60 = vmul.f32 %v1802_v58, %v1799_v57 }
 0x85e   : > { %v1806_v61 = vadd.f32 %v1805_v59, %v1804_v60 }
 0x860   : > { %1808 = vrot.lane.b32.xlu0 %v1806_v61, %s3100_s16 }
 0x8d2   : > { %v1809_v62 = vpop.permute.xlu0 %1808 }
 0x8d3   : > { %2433 = vst.msk [vmem:[%s3152_s27 + $0x8] sm:$0xf] %vm769_vm3, %v1809_v62  ;;  %v1815_v63 = vsel %vm247_vm2, %v1809_v62, 0 }
 0x8d4   : > { %v1886_v0 = vand.u32 4294901760, %v1815_v63 }
 0x8d6   : > { %v1887_v1 = vsub.f32 %v1815_v63, %v1886_v0 }
 0x8d8   : > { %v1888_v2 = vand.u32 4294901760, %v1887_v1 }
 0x8da   : > { %v1889_v3 = vsub.f32 %v1887_v1, %v1888_v2 }
 0x8dc   : > { %v1890_v5 = vand.u32 4294901760, %v1889_v3 }
 0x8de   : > { %2768 = vmatmul.mubr.f32.vlgmr.msra.gmra.mrb[2].mxu1 %v1890_v5 }
 0x8df   : > { %2941 = vmatpush3.bf16.msra.mxu1 %v3195_v33  ;;  %2778 = vmatprep.mubr.msk.f32.mxu1 %vm3097_vm1, %v3098_v9 }
 0x8e0   : > { %2942 = vmatprep.subr.bf16.mxu1 %v3096_v4 }
 0x8e3   : > { %2944 = vmatpush3.bf16.msra.mxu1 %v3198_v37 }
 0x8e4   : > { %2945 = vmatprep.subr.bf16.mxu1 %v3096_v4 }
 0x8e6   : > { %2779 = vmatmul.mubr.f32.vlgmr.msra.gmra.mrb[2].mxu1 %v1886_v0 }
 0x8e7   : > { %2947 = vmatpush3.bf16.msra.mxu1 %v3204_v38  ;;  %2789 = vmatprep.mubr.msk.f32.mxu1 %vm3097_vm1, %v3098_v9 }
 0x8e8   : > { %2948 = vmatprep.subr.bf16.mxu1 %v3096_v4 }
 0x8eb   : > { %2950 = vmatpush3.bf16.msra.mxu1 %v3209_v39  ;;  %v2434_v39 = vld [vmem:[%s3147_s24 + $0xc] sm:$0xf] }
 0x8ec   : > { %2951 = vmatprep.subr.bf16.mxu1 %v3096_v4 }
 0x8ee   : > { %2790 = vmatmul.mubr.f32.vlgmr.msra.gmra.mrb[2].mxu1 %v1887_v1 }
 0x8ef   : > { %2953 = vmatpush3.bf16.msra.mxu1 %v3178_v12  ;;  %2800 = vmatprep.mubr.msk.f32.mxu1 %vm3097_vm1, %v3098_v9 }
 0x8f0   : > { %2954 = vmatprep.subr.bf16.mxu1 %v3096_v4 }
 0x8f3   : > { %2956 = vmatpush3.bf16.msra.mxu1 %v3185_v19 }
 0x8f4   : > { %2957 = vmatprep.subr.bf16.mxu1 %v3096_v4 }
 0x8f6   : > { %2801 = vmatmul.mubr.f32.vlgmr.msra.gmra.mrb[2].mxu1 %v1888_v2 }
 0x8f7   : > { %2959 = vmatpush3.bf16.msra.mxu1 %v3221_v40  ;;  %2811 = vmatprep.mubr.msk.f32.mxu1 %vm3097_vm1, %v3098_v9 }
 0x8f8   : > { %2960 = vmatprep.subr.bf16.mxu1 %v3096_v4 }
 0x8fb   : > { %2962 = vmatpush3.bf16.msra.mxu1 %v3225_v41 }
 0x8fc   : > { %2963 = vmatprep.subr.bf16.mxu1 %v3096_v4 }
 0x8fe   : > { %2812 = vmatmul.mubr.f32.vlgmr.msra.gmra.mrb[2].mxu1 %v1886_v0 }
 0x8ff   : > { %2965 = vmatpush3.bf16.msra.mxu1 %v3178_v12  ;;  %2822 = vmatprep.mubr.msk.f32.mxu1 %vm3097_vm1, %v3098_v9 }
 0x900   : > { %2966 = vmatprep.subr.bf16.mxu1 %v3096_v4 }
 0x903   : > { %2968 = vmatpush3.bf16.msra.mxu1 %v3185_v19 }
 0x906   : > { %2823 = vmatmul.mubr.f32.vlgmr.msra.gmra.mrb[2].mxu1 %v1886_v0 }
 0x9d9   : > { %v2298_v33 = vpop.f32.mrb[2].mxu1 }
 0x9da   : > { %v2972_v37 = vadd.f32 %v3249_v42, %v2298_v33  ;;  %v2824_v38 = vpop.f32.mrb[3].mxu1 }
 0x9dc   : > { %2310 = vrot.lane.b32.xlu1 %v2972_v37, %s3099_s15  ;;  %v2302_v40 = vadd.f32 %v2972_v37, %v2434_v39 }
 0x9de   : > { %v2435_v41 = vmul.f32 -1.442695, %v2302_v40 }
 0x9e0   : > { %3052 = vpow2.f32 %v2435_v41 }
 0x9ea   : > { %v3053_v6 = vpop.eup %3052 }
 0x9eb   : > { %v2306_v12 = vadd.f32 1.0, %v3053_v6 }
 0x9ed   : > { %3054 = vrcp.f32 %v2306_v12 }
 0x9f7   : > { %v3055_v7 = vpop.eup %3054 }
 0x9f8   : > { %v2320_v10 = vsub.f32 1.0, %v3055_v7  ;;  %v2326_v13 = vmul.f32 %v3055_v7, %v1806_v61 }
 0xa4e   : > { %v2311_v9 = vpop.permute.xlu1 %2310 }
 0xa4f   : > { %v2313_v4 = vmul.f32 %v3055_v7, %v2311_v9 }
 0xa51   : > { %2315 = vrot.lane.b32.xlu0 %v2313_v4, %s3099_s15 }
 0xac3   : > { %v2316_v19 = vpop.permute.xlu0 %2315 }
 0xac4   : > { %v2318_v8 = vadd.f32 %v2434_v39, %v2316_v19 }
 0xac6   : > { %3056 = vtanh.f32 %v2318_v8 }
 0xad0   : > { %v3057_v42 = vpop.eup %3056 }
 0xad1   : > { %2322 = vrot.lane.b32.xlu1 %v3057_v42, %s3100_s16 }
 0xb43   : > { %v2323_v11 = vpop.permute.xlu1 %2322 }
 0xb44   : > { %v2325_v14 = vmul.f32 %v2323_v11, %v2320_v10 }
 0xb46   : > { %v2327_v15 = vadd.f32 %v2326_v13, %v2325_v14 }
 0xb48   : > { %2329 = vrot.lane.b32.xlu0 %v2327_v15, %s3100_s16 }
 0xbba   : > { %v2330_v16 = vpop.permute.xlu0 %2329 }
 0xbbb   : > { %2436 = vst.msk [vmem:[%s3152_s27 + $0xc] sm:$0xf] %vm769_vm3, %v2330_v16  ;;  %2334 = vst.msk [vmem:[#allocation2] sm:$0xf] %vm769_vm3, %v2330_v16 }
 0xbbc   : > { %2335 = vst.msk [vmem:[#allocation3] sm:$0xf] %vm769_vm3, %v2330_v16 }
 0xbbd   : > { %3071 = shalt.err (!%p3068_p12)
}
 0xbbe   : > { %s3072_s25 = scalar_lea.hbm %s3418_s5, 64 }
 0xbbf   : > { %p3073_p13 = scmp.ne.s32.totalorder %s3418_s5, %s3072_s25  ;;  %p3078_p2 = scmp.lt.u32.totalorder %s3072_s25, %s3418_s5 }
 0xbc1   : > { %p3074_p0 = pnand %p3073_p13, %p3017_p5 }
 0xbc3   : > { %p3075_p1 = pneg %p3074_p0 }
 0xbc5   : > { %p3080_p3 = pnand %p3078_p2, %p3075_p1 }
 0xbc7   : > { %3083 = shalt.err (!%p3080_p3)
}
 0xbc8   : > { %3014 = dma.vmem_to_hbm [thread:$0]  (%p3017_p5), %s2353_s21, 64, %s3418_s5, [#allocation4]  }
 0xbc9   : > { %3089 = dma.done.wait (%p3017_p5), [#allocation4], 64  }
 0xbca   : > { %3091 = vsyncadd (%p3017_p5), [#allocation4], 4294967232 }
 0xbcb PF: > { %s17_s18 = sadd.s32 1, %s3094_s18  }
 0xbcc   : > { %p14_p4 = scmp.ge.s32.totalorder %s17_s18, 4  }
 0xbce   :  { %16 = sbr.rel (!%p14_p4) target bundleno = 1 (0x1), region = 85 }
 0xbd5   :  { %2373 = vsyncpa [#allocation4], 1 }
 0xbd6   :  { %2375 = vsyncpa [#allocation4 + $0x1], 1 }

</bundles_post_ra>
